<compile_context>
chip_gen: v7x
topology: tpu7x:2x2x1
jax: 0.10.0
libtpu: 0.0.40
codegen_flags: <defaults>
</compile_context>

<pallas_src>
import functools
import numpy as np

import jax
import jax.numpy as jnp
from jax.experimental import pallas as pl
from jax.experimental.pallas import tpu as pltpu

EPS = 1e-5  # torch.nn.LayerNorm default


# ----------------------------- kernel helpers ------------------------------

def _layer_norm(x, gamma, beta):
    mu = jnp.mean(x, axis=-1, keepdims=True)
    var = jnp.mean((x - mu) ** 2, axis=-1, keepdims=True)
    return (x - mu) * jax.lax.rsqrt(var + EPS) * gamma + beta


# ------------------------------- the kernel --------------------------------

def decoder_layer_kernel(
    dec_ref, enc_ref, npm_ref, slf_mask_ref, enc_mask_ref,
    s_wqkv, s_bqkv, s_wo, s_bo, s_g, s_b,
    e_wq, e_bq, e_wkv, e_bkv, e_wo, e_bo, e_g, e_b,
    f_w1, f_b1, f_w2, f_b2, f_g, f_b,
    out_ref, slf_attn_ref, enc_attn_ref,
    *, n_head, d_k, d_v, compute_dtype, approx_recip):
    Bb, Lq, D = dec_ref.shape
    Lk = enc_ref.shape[1]
    H = n_head
    cdt = compute_dtype

    # Flatten activations to (Bb*L, D): all projections / FFN matmuls get one
    # large M dimension per grid step.
    x = dec_ref[...].reshape(Bb * Lq, D)                  # f32
    enc = enc_ref[...].reshape(Bb * Lk, D)                # f32
    npm = npm_ref[...].reshape(Bb * Lq, 1)                # f32

    # Mask predicates (int8 in HBM), computed once and reused by every head.
    slf_masked = slf_mask_ref[...].astype(jnp.float32) > 0.0   # (Bb, Lq, Lq)
    enc_masked = enc_mask_ref[...].astype(jnp.float32) > 0.0   # (Bb, Lq, Lk)

    def attention(q, k, v, masked, wo, bo, g, be, residual, attn_ref, Lkv):
        # q: (Bb*Lq, H*dk) f32, already scaled by 1/sqrt(d_k) (folded into W_q)
        # k: (Bb*Lkv, H*dk), v: (Bb*Lkv, H*dv)
        q3 = q.reshape(Bb, Lq, H * d_k)
        k3 = k.reshape(Bb, Lkv, H * d_k)
        v3 = v.reshape(Bb, Lkv, H * d_v)
        o_acc = jnp.zeros((Bb * Lq, D), jnp.float32)
        for h in range(H):                         # static unroll over heads
            qh = q3[:, :, h * d_k:(h + 1) * d_k].astype(cdt)
            kh = k3[:, :, h * d_k:(h + 1) * d_k].astype(cdt)
            vh = v3[:, :, h * d_v:(h + 1) * d_v].astype(cdt)
            s = jnp.einsum('bqd,bkd->bqk', qh, kh,
                           preferred_element_type=jnp.float32)
            s = jnp.where(masked, -jnp.inf, s)     # masked_fill(mask, -inf)
            m = jnp.max(s, axis=-1, keepdims=True)
            e = jnp.exp(s - m)
            attn = e * pl.reciprocal(jnp.sum(e, axis=-1, keepdims=True),
                                     approx=approx_recip)
            if attn_ref is not None:
                attn_ref[:, h] = attn              # (Bb, Lq, Lkv) slice of (Bb,H,Lq,Lkv)
            oh = jnp.einsum('bqk,bkd->bqd', attn.astype(cdt), vh,
                            preferred_element_type=jnp.float32)
            # Fold this head's slice of W_o straight into the accumulator
            # (no per-head concat / layout shuffle).
            o_acc = o_acc + jnp.dot(oh.reshape(Bb * Lq, d_v).astype(cdt),
                                    wo[h * d_v:(h + 1) * d_v, :],
                                    preferred_element_type=jnp.float32)
        # TODO(synk): dropout is eval-mode identity (inference kernel).
        return _layer_norm(o_acc + bo + residual, g, be)

    # --- self attention: single fused QKV projection ---
    qkv = jnp.dot(x.astype(cdt), s_wqkv[...],
                  preferred_element_type=jnp.float32) + s_bqkv[...]
    out = attention(qkv[:, :H * d_k],
                    qkv[:, H * d_k:2 * H * d_k],
                    qkv[:, 2 * H * d_k:],
                    slf_masked, s_wo[...], s_bo[...], s_g[...], s_b[...],
                    x, slf_attn_ref, Lq)
    out = out * npm

    # --- encoder-decoder attention: fused KV projection from enc_output ---
    q = jnp.dot(out.astype(cdt), e_wq[...],
                preferred_element_type=jnp.float32) + e_bq[...]
    kv = jnp.dot(enc.astype(cdt), e_wkv[...],
                 preferred_element_type=jnp.float32) + e_bkv[...]
    out = attention(q, kv[:, :H * d_k], kv[:, H * d_k:],
                    enc_masked, e_wo[...], e_bo[...], e_g[...], e_b[...],
                    out, enc_attn_ref, Lk)
    out = out * npm

    # --- position-wise feed forward (Conv1d k=1 == dense) ---
    h1 = jnp.maximum(
        jnp.dot(out.astype(cdt), f_w1[...],
                preferred_element_type=jnp.float32) + f_b1[...], 0.0)
    y = jnp.dot(h1.astype(cdt), f_w2[...],
                preferred_element_type=jnp.float32) + f_b2[...]
    y = _layer_norm(y + out, f_g[...], f_b[...]) * npm

    out_ref[...] = y.reshape(Bb, Lq, D)


# ------------------------------- the wrapper --------------------------------

def decoder_layer(dec_input, enc_output, non_pad_mask, slf_attn_mask,
                  dec_enc_attn_mask, params, *, n_head, d_k, d_v,
                  compute_dtype=jnp.float32, block_b=1, return_attns=True):
    B, Lq, D = dec_input.shape
    Lk = enc_output.shape[1]
    assert B % block_b == 0, "batch must be divisible by block_b"
    grid = (B // block_b,)
    # bf16 path uses the (nearly free) EUP approximate reciprocal for softmax.
    approx = compute_dtype != jnp.float32

    (s_wq, s_bq, s_wk, s_bk, s_wv, s_bv, s_wo, s_bo, s_g, s_b,
     e_wq, e_bq, e_wk, e_bk, e_wv, e_bv, e_wo, e_bo, e_g, e_b,
     f_w1, f_b1, f_w2, f_b2, f_g, f_b) = params

    wdt = compute_dtype                     # MXU operand dtype (bf16 fast path)
    scale = 1.0 / (d_k ** 0.5)
    # Fold 1/sqrt(d_k) into the Q projection; fuse Q/K/V (self) and K/V (enc).
    s_wqkv = jnp.concatenate([s_wq * scale, s_wk, s_wv], axis=1).astype(wdt)
    s_bqkv = jnp.concatenate([s_bq * scale, s_bk, s_bv], axis=1)
    e_wq_s = (e_wq * scale).astype(wdt)
    e_bq_s = e_bq * scale
    e_wkv = jnp.concatenate([e_wk, e_wv], axis=1).astype(wdt)
    e_bkv = jnp.concatenate([e_bk, e_bv], axis=1)

    weights = [
        s_wqkv, s_bqkv, s_wo.astype(wdt), s_bo, s_g, s_b,
        e_wq_s, e_bq_s, e_wkv, e_bkv, e_wo.astype(wdt), e_bo, e_g, e_b,
        f_w1.astype(wdt), f_b1, f_w2.astype(wdt), f_b2, f_g, f_b,
    ]

    # int8 masks: 4x less HBM read traffic than f32 at real sequence lengths.
    slf_mask_i8 = (slf_attn_mask > 0).astype(jnp.int8)
    enc_mask_i8 = (dec_enc_attn_mask > 0).astype(jnp.int8)

    per_batch3 = lambda b: (b, 0, 0)
    in_specs = [
        pl.BlockSpec((block_b, Lq, D), per_batch3),
        pl.BlockSpec((block_b, Lk, D), per_batch3),
        pl.BlockSpec((block_b, Lq, 1), per_batch3),
        pl.BlockSpec((block_b, Lq, Lq), per_batch3),
        pl.BlockSpec((block_b, Lq, Lk), per_batch3),
    ]
    # Weights / LN params: full 2-D blocks with a constant index map.
    # TODO(synk): at production sizes single-buffer these constant blocks
    # (pl.Buffered(1)) to halve their VMEM footprint on v7x.
    in_specs += [pl.BlockSpec(w.shape, lambda b: (0, 0)) for w in weights]

    out_specs = [pl.BlockSpec((block_b, Lq, D), per_batch3)]
    out_shape = [jax.ShapeDtypeStruct((B, Lq, D), jnp.float32)]
    if return_attns:
        out_specs += [
            pl.BlockSpec((block_b, n_head, Lq, Lq), lambda b: (b, 0, 0, 0)),
            pl.BlockSpec((block_b, n_head, Lq, Lk), lambda b: (b, 0, 0, 0)),
        ]
        out_shape += [
            jax.ShapeDtypeStruct((B, n_head, Lq, Lq), jnp.float32),
            jax.ShapeDtypeStruct((B, n_head, Lq, Lk), jnp.float32),
        ]

    kernel_impl = functools.partial(
        decoder_layer_kernel, n_head=n_head, d_k=d_k, d_v=d_v,
        compute_dtype=compute_dtype, approx_recip=approx)
    if return_attns:
        kernel = kernel_impl
    else:
        def kernel(*refs):                  # 25 inputs + 1 output ref
            kernel_impl(*refs, None, None)

    results = pl.pallas_call(
        kernel,
        grid=grid,
        in_specs=in_specs,
        out_specs=out_specs,
        out_shape=out_shape,
        compiler_params=pltpu.CompilerParams(
            dimension_semantics=("parallel",),
            vmem_limit_bytes=64 * 1024 * 1024),
    )(dec_input, enc_output, non_pad_mask, slf_mask_i8, enc_mask_i8, *weights)

    if return_attns:
        dec_out, slf_attn, enc_attn = results
        # (B, H, Lq, Lk) -> (H*B, Lq, Lk), PyTorch's head-major stacking.
        slf_attn = jnp.transpose(slf_attn, (1, 0, 2, 3)).reshape(n_head * B, Lq, Lq)
        enc_attn = jnp.transpose(enc_attn, (1, 0, 2, 3)).reshape(n_head * B, Lq, Lk)
        return dec_out, slf_attn, enc_attn
    (dec_out,) = results
    return dec_out, None, None


# ---------------------------- pure-JAX reference ----------------------------

def _reference(dec_input, enc_output, npm, slf_mask, enc_mask, params,
               n_head, d_k, d_v):
    (s_wq, s_bq, s_wk, s_bk, s_wv, s_bv, s_wo, s_bo, s_g, s_b,
     e_wq, e_bq, e_wk, e_bk, e_wv, e_bv, e_wo, e_bo, e_g, e_b,
     f_w1, f_b1, f_w2, f_b2, f_g, f_b) = params

    def ln(x, g, be):
        mu = x.mean(-1, keepdims=True)
        var = ((x - mu) ** 2).mean(-1, keepdims=True)
        return (x - mu) / jnp.sqrt(var + EPS) * g + be

    def mha(xq, xkv, mask, wq, bq, wk, bk, wv, bv, wo, bo, g, be):
        B, Lq, _ = xq.shape
        Lk = xkv.shape[1]
        q = (xq @ wq + bq).reshape(B, Lq, n_head, d_k)
        k = (xkv @ wk + bk).reshape(B, Lk, n_head, d_k)
        v = (xkv @ wv + bv).reshape(B, Lk, n_head, d_v)
        s = jnp.einsum('bqhd,bkhd->bhqk', q, k) / (d_k ** 0.5)
        s = jnp.where(mask[:, None] > 0, -jnp.inf, s)
        attn = jax.nn.softmax(s, axis=-1)                      # (B, H, Lq, Lk)
        o = jnp.einsum('bhqk,bkhd->bqhd', attn, v).reshape(B, Lq, n_head * d_v)
        o = o @ wo + bo
        attn_hb = jnp.transpose(attn, (1, 0, 2, 3)).reshape(n_head * B, Lq, Lk)
        return ln(o + xq, g, be), attn_hb

    out, slf_attn = mha(dec_input, dec_input, slf_mask,
                        s_wq, s_bq, s_wk, s_bk, s_wv, s_bv, s_wo, s_bo, s_g, s_b)
    out = out * npm
    out, enc_attn = mha(out, enc_output, enc_mask,
                        e_wq, e_bq, e_wk, e_bk, e_wv, e_bv, e_wo, e_bo, e_g, e_b)
    out = out * npm
    residual = out
    y = jnp.maximum(out @ f_w1 + f_b1, 0.0) @ f_w2 + f_b2
    y = ln(y + residual, f_g, f_b) * npm
    return y, slf_attn, enc_attn


# ----------------------------------- main ------------------------------------

if __name__ == "__main__":
    B, Lq, Lk = 2, 8, 16
    d_model, d_inner = 32, 64
    n_head, d_k, d_v = 2, 16, 16

    key = jax.random.PRNGKey(0)
    ks = list(jax.random.split(key, 40))
    nxt = iter(ks)

    def w(shape, scale=0.1):
        return (jax.random.normal(next(nxt), shape, jnp.float32) * scale)

    def attn_params():
        return [
            w((d_model, n_head * d_k)), w((1, n_head * d_k)),   # Wq, bq
            w((d_model, n_head * d_k)), w((1, n_head * d_k)),   # Wk, bk
            w((d_model, n_head * d_v)), w((1, n_head * d_v)),   # Wv, bv
            w((n_head * d_v, d_model)), w((1, d_model)),        # Wo, bo
            jnp.ones((1, d_model), jnp.float32) + w((1, d_model), 0.01),  # LN gamma
            w((1, d_model), 0.01),                              # LN beta
        ]

    params = (
        attn_params()                      # self attention
        + attn_params()                    # enc-dec attention
        + [
            w((d_model, d_inner)), w((1, d_inner)),             # FFN W1, b1
            w((d_inner, d_model)), w((1, d_model)),             # FFN W2, b2
            jnp.ones((1, d_model), jnp.float32) + w((1, d_model), 0.01),
            w((1, d_model), 0.01),
        ]
    )

    dec_input = jax.random.normal(next(nxt), (B, Lq, d_model), jnp.float32)
    enc_output = jax.random.normal(next(nxt), (B, Lk, d_model), jnp.float32)

    # non-pad mask: last decoder position of batch 1 is padding
    non_pad_mask = jnp.ones((B, Lq, 1), jnp.float32).at[1, Lq - 1, 0].set(0.0)
    # causal self-attention mask (1.0 = masked future position)
    slf_attn_mask = jnp.triu(jnp.ones((Lq, Lq), jnp.float32), k=1)[None].repeat(B, 0)
    # enc-dec mask: last 4 encoder positions of batch 1 are padding
    dec_enc_attn_mask = jnp.zeros((B, Lq, Lk), jnp.float32).at[1, :, Lk - 4:].set(1.0)

    ref_out, ref_slf, ref_enc = _reference(
        dec_input, enc_output, non_pad_mask, slf_attn_mask, dec_enc_attn_mask,
        params, n_head, d_k, d_v)

    # ---- exact path: f32 MXU operands, exact reciprocal, all batches in one
    #      grid step (fully flattened rows), attention maps returned ----
    dec_out, slf_attn, enc_attn = jax.block_until_ready(
        decoder_layer(dec_input, enc_output, non_pad_mask, slf_attn_mask,
                      dec_enc_attn_mask, params, n_head=n_head, d_k=d_k,
                      d_v=d_v, compute_dtype=jnp.float32, block_b=B,
                      return_attns=True))

    assert dec_out.shape == (B, Lq, d_model)
    assert slf_attn.shape == (n_head * B, Lq, Lq)
    assert enc_attn.shape == (n_head * B, Lq, Lk)
    np.testing.assert_allclose(np.asarray(dec_out), np.asarray(ref_out),
                               atol=1e-4, rtol=1e-4)
    np.testing.assert_allclose(np.asarray(slf_attn), np.asarray(ref_slf),
                               atol=1e-5, rtol=1e-4)
    np.testing.assert_allclose(np.asarray(enc_attn), np.asarray(ref_enc),
                               atol=1e-5, rtol=1e-4)

    # ---- fast path: bf16 MXU operands (f32 accumulation), approx softmax
    #      reciprocal, no attention-map writeback, 2 parallel grid steps ----
    fast_out, _, _ = jax.block_until_ready(
        decoder_layer(dec_input, enc_output, non_pad_mask, slf_attn_mask,
                      dec_enc_attn_mask, params, n_head=n_head, d_k=d_k,
                      d_v=d_v, compute_dtype=jnp.bfloat16, block_b=1,
                      return_attns=False))
    np.testing.assert_allclose(np.asarray(fast_out), np.asarray(ref_out),
                               atol=1e-1, rtol=1e-1)

    print("KERNEL_OK")
</pallas_src>

<mosaic_0001>
module attributes {stable_mosaic.version = 11 : i64} {
  func.func @decoder_layer_kernel(%arg0: i32, %arg1: memref<2x8x32xf32, #tpu.memory_space<vmem>>, %arg2: memref<2x16x32xf32, #tpu.memory_space<vmem>>, %arg3: memref<2x8x1xf32, #tpu.memory_space<vmem>>, %arg4: memref<2x8x8xi8, #tpu.memory_space<vmem>>, %arg5: memref<2x8x16xi8, #tpu.memory_space<vmem>>, %arg6: memref<32x96xf32, #tpu.memory_space<vmem>>, %arg7: memref<1x96xf32, #tpu.memory_space<vmem>>, %arg8: memref<32x32xf32, #tpu.memory_space<vmem>>, %arg9: memref<1x32xf32, #tpu.memory_space<vmem>>, %arg10: memref<1x32xf32, #tpu.memory_space<vmem>>, %arg11: memref<1x32xf32, #tpu.memory_space<vmem>>, %arg12: memref<32x32xf32, #tpu.memory_space<vmem>>, %arg13: memref<1x32xf32, #tpu.memory_space<vmem>>, %arg14: memref<32x64xf32, #tpu.memory_space<vmem>>, %arg15: memref<1x64xf32, #tpu.memory_space<vmem>>, %arg16: memref<32x32xf32, #tpu.memory_space<vmem>>, %arg17: memref<1x32xf32, #tpu.memory_space<vmem>>, %arg18: memref<1x32xf32, #tpu.memory_space<vmem>>, %arg19: memref<1x32xf32, #tpu.memory_space<vmem>>, %arg20: memref<32x64xf32, #tpu.memory_space<vmem>>, %arg21: memref<1x64xf32, #tpu.memory_space<vmem>>, %arg22: memref<64x32xf32, #tpu.memory_space<vmem>>, %arg23: memref<1x32xf32, #tpu.memory_space<vmem>>, %arg24: memref<1x32xf32, #tpu.memory_space<vmem>>, %arg25: memref<1x32xf32, #tpu.memory_space<vmem>>, %arg26: memref<2x8x32xf32, #tpu.memory_space<vmem>>, %arg27: memref<2x2x8x8xf32, #tpu.memory_space<vmem>>, %arg28: memref<2x2x8x16xf32, #tpu.memory_space<vmem>>) attributes {dimension_semantics = [#tpu.dimension_semantics<parallel>], iteration_bounds = array<i64: 1>, scalar_prefetch = 0 : i64, scratch_operands = 0 : i64, tpu.core_type = #tpu.core_type<tc>, window_params = [{transform_indices = @transform_0, window_bounds = array<i64: 2, 8, 32>}, {transform_indices = @transform_1, window_bounds = array<i64: 2, 16, 32>}, {transform_indices = @transform_2, window_bounds = array<i64: 2, 8, 1>}, {transform_indices = @transform_3, window_bounds = array<i64: 2, 8, 8>}, {transform_indices = @transform_4, window_bounds = array<i64: 2, 8, 16>}, {pipeline_mode = #tpu.pipeline_mode<synchronous>, transform_indices = @transform_5, window_bounds = array<i64: 32, 96>}, {pipeline_mode = #tpu.pipeline_mode<synchronous>, transform_indices = @transform_6, window_bounds = array<i64: 1, 96>}, {pipeline_mode = #tpu.pipeline_mode<synchronous>, transform_indices = @transform_7, window_bounds = array<i64: 32, 32>}, {pipeline_mode = #tpu.pipeline_mode<synchronous>, transform_indices = @transform_8, window_bounds = array<i64: 1, 32>}, {pipeline_mode = #tpu.pipeline_mode<synchronous>, transform_indices = @transform_9, window_bounds = array<i64: 1, 32>}, {pipeline_mode = #tpu.pipeline_mode<synchronous>, transform_indices = @transform_10, window_bounds = array<i64: 1, 32>}, {pipeline_mode = #tpu.pipeline_mode<synchronous>, transform_indices = @transform_11, window_bounds = array<i64: 32, 32>}, {pipeline_mode = #tpu.pipeline_mode<synchronous>, transform_indices = @transform_12, window_bounds = array<i64: 1, 32>}, {pipeline_mode = #tpu.pipeline_mode<synchronous>, transform_indices = @transform_13, window_bounds = array<i64: 32, 64>}, {pipeline_mode = #tpu.pipeline_mode<synchronous>, transform_indices = @transform_14, window_bounds = array<i64: 1, 64>}, {pipeline_mode = #tpu.pipeline_mode<synchronous>, transform_indices = @transform_15, window_bounds = array<i64: 32, 32>}, {pipeline_mode = #tpu.pipeline_mode<synchronous>, transform_indices = @transform_16, window_bounds = array<i64: 1, 32>}, {pipeline_mode = #tpu.pipeline_mode<synchronous>, transform_indices = @transform_17, window_bounds = array<i64: 1, 32>}, {pipeline_mode = #tpu.pipeline_mode<synchronous>, transform_indices = @transform_18, window_bounds = array<i64: 1, 32>}, {pipeline_mode = #tpu.pipeline_mode<synchronous>, transform_indices = @transform_19, window_bounds = array<i64: 32, 64>}, {pipeline_mode = #tpu.pipeline_mode<synchronous>, transform_indices = @transform_20, window_bounds = array<i64: 1, 64>}, {pipeline_mode = #tpu.pipeline_mode<synchronous>, transform_indices = @transform_21, window_bounds = array<i64: 64, 32>}, {pipeline_mode = #tpu.pipeline_mode<synchronous>, transform_indices = @transform_22, window_bounds = array<i64: 1, 32>}, {pipeline_mode = #tpu.pipeline_mode<synchronous>, transform_indices = @transform_23, window_bounds = array<i64: 1, 32>}, {pipeline_mode = #tpu.pipeline_mode<synchronous>, transform_indices = @transform_24, window_bounds = array<i64: 1, 32>}, {transform_indices = @transform_25, window_bounds = array<i64: 2, 8, 32>}, {transform_indices = @transform_26, window_bounds = array<i64: 2, 2, 8, 8>}, {transform_indices = @transform_27, window_bounds = array<i64: 2, 2, 8, 16>}]} {
    %c0 = arith.constant 0 : index
    %c0_0 = arith.constant 0 : index
    %c0_1 = arith.constant 0 : index
    %0 = vector.load %arg1[%c0, %c0_0, %c0_1] : memref<2x8x32xf32, #tpu.memory_space<vmem>>, vector<2x8x32xf32>
    %1 = vector.shape_cast %0 : vector<2x8x32xf32> to vector<16x32xf32>
    %c0_2 = arith.constant 0 : index
    %c0_3 = arith.constant 0 : index
    %c0_4 = arith.constant 0 : index
    %2 = vector.load %arg2[%c0_2, %c0_3, %c0_4] : memref<2x16x32xf32, #tpu.memory_space<vmem>>, vector<2x16x32xf32>
    %3 = vector.shape_cast %2 : vector<2x16x32xf32> to vector<32x32xf32>
    %c0_5 = arith.constant 0 : index
    %c0_6 = arith.constant 0 : index
    %c0_7 = arith.constant 0 : index
    %4 = vector.load %arg3[%c0_5, %c0_6, %c0_7] : memref<2x8x1xf32, #tpu.memory_space<vmem>>, vector<2x8x1xf32>
    %5 = vector.shape_cast %4 : vector<2x8x1xf32> to vector<16x1xf32>
    %c0_8 = arith.constant 0 : index
    %c0_9 = arith.constant 0 : index
    %c0_10 = arith.constant 0 : index
    %6 = vector.load %arg4[%c0_8, %c0_9, %c0_10] : memref<2x8x8xi8, #tpu.memory_space<vmem>>, vector<2x8x8xi8>
    %7 = arith.sitofp %6 : vector<2x8x8xi8> to vector<2x8x8xf32>
    %cst = arith.constant 0.000000e+00 : f32
    %8 = vector.broadcast %cst : f32 to vector<2x8x8xf32>
    %9 = arith.cmpf ogt, %7, %8 : vector<2x8x8xf32>
    %c0_11 = arith.constant 0 : index
    %c0_12 = arith.constant 0 : index
    %c0_13 = arith.constant 0 : index
    %10 = vector.load %arg5[%c0_11, %c0_12, %c0_13] : memref<2x8x16xi8, #tpu.memory_space<vmem>>, vector<2x8x16xi8>
    %11 = arith.sitofp %10 : vector<2x8x16xi8> to vector<2x8x16xf32>
    %cst_14 = arith.constant 0.000000e+00 : f32
    %12 = vector.broadcast %cst_14 : f32 to vector<2x8x16xf32>
    %13 = arith.cmpf ogt, %11, %12 : vector<2x8x16xf32>
    %c0_15 = arith.constant 0 : index
    %c0_16 = arith.constant 0 : index
    %14 = vector.load %arg6[%c0_15, %c0_16] : memref<32x96xf32, #tpu.memory_space<vmem>>, vector<32x96xf32>
    %cst_17 = arith.constant dense<0.000000e+00> : vector<16x96xf32>
    %15 = tpu.matmul %1, %14, %cst_17 {dimension_numbers = #tpu.dot_dimension_numbers<[1], [0], [0], [1], [0, 0, 1, 1], [], []>} : vector<16x32xf32>, vector<32x96xf32>, vector<16x96xf32> -> vector<16x96xf32>
    %c0_18 = arith.constant 0 : index
    %c0_19 = arith.constant 0 : index
    %16 = vector.load %arg7[%c0_18, %c0_19] : memref<1x96xf32, #tpu.memory_space<vmem>>, vector<1x96xf32>
    %17 = vector.broadcast %16 : vector<1x96xf32> to vector<16x96xf32>
    %18 = arith.addf %15, %17 : vector<16x96xf32>
    %19 = vector.extract_strided_slice %18 {offsets = [0, 0], sizes = [16, 32], strides = [1, 1]} : vector<16x96xf32> to vector<16x32xf32>
    %20 = vector.extract_strided_slice %18 {offsets = [0, 32], sizes = [16, 32], strides = [1, 1]} : vector<16x96xf32> to vector<16x32xf32>
    %21 = vector.extract_strided_slice %18 {offsets = [0, 64], sizes = [16, 32], strides = [1, 1]} : vector<16x96xf32> to vector<16x32xf32>
    %c0_20 = arith.constant 0 : index
    %c0_21 = arith.constant 0 : index
    %22 = vector.load %arg8[%c0_20, %c0_21] : memref<32x32xf32, #tpu.memory_space<vmem>>, vector<32x32xf32>
    %c0_22 = arith.constant 0 : index
    %c0_23 = arith.constant 0 : index
    %23 = vector.load %arg9[%c0_22, %c0_23] : memref<1x32xf32, #tpu.memory_space<vmem>>, vector<1x32xf32>
    %c0_24 = arith.constant 0 : index
    %c0_25 = arith.constant 0 : index
    %24 = vector.load %arg10[%c0_24, %c0_25] : memref<1x32xf32, #tpu.memory_space<vmem>>, vector<1x32xf32>
    %c0_26 = arith.constant 0 : index
    %c0_27 = arith.constant 0 : index
    %25 = vector.load %arg11[%c0_26, %c0_27] : memref<1x32xf32, #tpu.memory_space<vmem>>, vector<1x32xf32>
    %26 = vector.shape_cast %19 : vector<16x32xf32> to vector<2x8x32xf32>
    %27 = vector.shape_cast %20 : vector<16x32xf32> to vector<2x8x32xf32>
    %28 = vector.shape_cast %21 : vector<16x32xf32> to vector<2x8x32xf32>
    %cst_28 = arith.constant 0.000000e+00 : f32
    %29 = vector.broadcast %cst_28 : f32 to vector<16x32xf32>
    %30 = vector.extract_strided_slice %26 {offsets = [0, 0, 0], sizes = [2, 8, 16], strides = [1, 1, 1]} : vector<2x8x32xf32> to vector<2x8x16xf32>
    %31 = vector.extract_strided_slice %27 {offsets = [0, 0, 0], sizes = [2, 8, 16], strides = [1, 1, 1]} : vector<2x8x32xf32> to vector<2x8x16xf32>
    %32 = vector.extract_strided_slice %28 {offsets = [0, 0, 0], sizes = [2, 8, 16], strides = [1, 1, 1]} : vector<2x8x32xf32> to vector<2x8x16xf32>
    "tpu.trace_start"() <{level = 10 : i32, message = "bqd,bkd->bqk"}> : () -> ()
    %cst_29 = arith.constant dense<0.000000e+00> : vector<2x8x8xf32>
    %33 = tpu.matmul %30, %31, %cst_29 {dimension_numbers = #tpu.dot_dimension_numbers<[2], [2], [1], [1], [0, 0, 0, 1, 1, 1], [0], [0]>} : vector<2x8x16xf32>, vector<2x8x16xf32>, vector<2x8x8xf32> -> vector<2x8x8xf32>
    %cst_30 = arith.constant 0xFF800000 : f32
    "tpu.trace_stop"() : () -> ()
    %34 = vector.broadcast %cst_30 : f32 to vector<2x8x8xf32>
    %35 = arith.select %9, %34, %33 : vector<2x8x8xi1>, vector<2x8x8xf32>
    %cst_31 = arith.constant dense<0xFF800000> : vector<2x8xf32>
    %36 = vector.multi_reduction <maximumf>, %35, %cst_31 [2] : vector<2x8x8xf32> to vector<2x8xf32>
    %37 = vector.shape_cast %36 : vector<2x8xf32> to vector<2x8x1xf32>
    %38 = vector.broadcast %37 : vector<2x8x1xf32> to vector<2x8x8xf32>
    %39 = arith.subf %35, %38 : vector<2x8x8xf32>
    %40 = math.exp %39 : vector<2x8x8xf32>
    %cst_32 = arith.constant dense<0.000000e+00> : vector<2x8xf32>
    %41 = vector.multi_reduction <add>, %40, %cst_32 [2] : vector<2x8x8xf32> to vector<2x8xf32>
    %42 = vector.shape_cast %41 : vector<2x8xf32> to vector<2x8x1xf32>
    %43 = tpu.reciprocal %42 : vector<2x8x1xf32> -> vector<2x8x1xf32>
    %44 = vector.broadcast %43 : vector<2x8x1xf32> to vector<2x8x8xf32>
    %45 = arith.mulf %40, %44 : vector<2x8x8xf32>
    %c0_33 = arith.constant 0 : index
    %c0_34 = arith.constant 0 : index
    %c0_35 = arith.constant 0 : index
    %c0_36 = arith.constant 0 : index
    %46 = vector.load %arg27[%c0_33, %c0_34, %c0_35, %c0_36] : memref<2x2x8x8xf32, #tpu.memory_space<vmem>>, vector<2x1x8x8xf32>
    %47 = vector.shape_cast %46 : vector<2x1x8x8xf32> to vector<2x8x8xf32>
    %48 = vector.shape_cast %45 : vector<2x8x8xf32> to vector<2x1x8x8xf32>
    tpu.vector_store %arg27[%c0_33, %c0_34, %c0_35, %c0_36], %48 {strides = array<i32>} : memref<2x2x8x8xf32, #tpu.memory_space<vmem>>, vector<2x1x8x8xf32>,
    "tpu.trace_start"() <{level = 10 : i32, message = "bqk,bkd->bqd"}> : () -> ()
    %cst_37 = arith.constant dense<0.000000e+00> : vector<2x8x16xf32>
    %49 = tpu.matmul %45, %32, %cst_37 {dimension_numbers = #tpu.dot_dimension_numbers<[2], [1], [1], [2], [0, 0, 0, 1, 1, 2], [0], [0]>} : vector<2x8x8xf32>, vector<2x8x16xf32>, vector<2x8x16xf32> -> vector<2x8x16xf32>
    "tpu.trace_stop"() : () -> ()
    %50 = vector.shape_cast %49 : vector<2x8x16xf32> to vector<16x16xf32>
    %51 = vector.extract_strided_slice %22 {offsets = [0, 0], sizes = [16, 32], strides = [1, 1]} : vector<32x32xf32> to vector<16x32xf32>
    %cst_38 = arith.constant dense<0.000000e+00> : vector<16x32xf32>
    %52 = tpu.matmul %50, %51, %cst_38 {dimension_numbers = #tpu.dot_dimension_numbers<[1], [0], [0], [1], [0, 0, 1, 1], [], []>} : vector<16x16xf32>, vector<16x32xf32>, vector<16x32xf32> -> vector<16x32xf32>
    %53 = arith.addf %29, %52 : vector<16x32xf32>
    %54 = vector.extract_strided_slice %26 {offsets = [0, 0, 16], sizes = [2, 8, 16], strides = [1, 1, 1]} : vector<2x8x32xf32> to vector<2x8x16xf32>
    %55 = vector.extract_strided_slice %27 {offsets = [0, 0, 16], sizes = [2, 8, 16], strides = [1, 1, 1]} : vector<2x8x32xf32> to vector<2x8x16xf32>
    %56 = vector.extract_strided_slice %28 {offsets = [0, 0, 16], sizes = [2, 8, 16], strides = [1, 1, 1]} : vector<2x8x32xf32> to vector<2x8x16xf32>
    "tpu.trace_start"() <{level = 10 : i32, message = "bqd,bkd->bqk"}> : () -> ()
    %cst_39 = arith.constant dense<0.000000e+00> : vector<2x8x8xf32>
    %57 = tpu.matmul %54, %55, %cst_39 {dimension_numbers = #tpu.dot_dimension_numbers<[2], [2], [1], [1], [0, 0, 0, 1, 1, 1], [0], [0]>} : vector<2x8x16xf32>, vector<2x8x16xf32>, vector<2x8x8xf32> -> vector<2x8x8xf32>
    %cst_40 = arith.constant 0xFF800000 : f32
    "tpu.trace_stop"() : () -> ()
    %58 = vector.broadcast %cst_40 : f32 to vector<2x8x8xf32>
    %59 = arith.select %9, %58, %57 : vector<2x8x8xi1>, vector<2x8x8xf32>
    %cst_41 = arith.constant dense<0xFF800000> : vector<2x8xf32>
    %60 = vector.multi_reduction <maximumf>, %59, %cst_41 [2] : vector<2x8x8xf32> to vector<2x8xf32>
    %61 = vector.shape_cast %60 : vector<2x8xf32> to vector<2x8x1xf32>
    %62 = vector.broadcast %61 : vector<2x8x1xf32> to vector<2x8x8xf32>
    %63 = arith.subf %59, %62 : vector<2x8x8xf32>
    %64 = math.exp %63 : vector<2x8x8xf32>
    %cst_42 = arith.constant dense<0.000000e+00> : vector<2x8xf32>
    %65 = vector.multi_reduction <add>, %64, %cst_42 [2] : vector<2x8x8xf32> to vector<2x8xf32>
    %66 = vector.shape_cast %65 : vector<2x8xf32> to vector<2x8x1xf32>
    %67 = tpu.reciprocal %66 : vector<2x8x1xf32> -> vector<2x8x1xf32>
    %68 = vector.broadcast %67 : vector<2x8x1xf32> to vector<2x8x8xf32>
    %69 = arith.mulf %64, %68 : vector<2x8x8xf32>
    %c0_43 = arith.constant 0 : index
    %c1 = arith.constant 1 : index
    %c0_44 = arith.constant 0 : index
    %c0_45 = arith.constant 0 : index
    %70 = vector.load %arg27[%c0_43, %c1, %c0_44, %c0_45] : memref<2x2x8x8xf32, #tpu.memory_space<vmem>>, vector<2x1x8x8xf32>
    %71 = vector.shape_cast %70 : vector<2x1x8x8xf32> to vector<2x8x8xf32>
    %72 = vector.shape_cast %69 : vector<2x8x8xf32> to vector<2x1x8x8xf32>
    tpu.vector_store %arg27[%c0_43, %c1, %c0_44, %c0_45], %72 {strides = array<i32>} : memref<2x2x8x8xf32, #tpu.memory_space<vmem>>, vector<2x1x8x8xf32>,
    "tpu.trace_start"() <{level = 10 : i32, message = "bqk,bkd->bqd"}> : () -> ()
    %cst_46 = arith.constant dense<0.000000e+00> : vector<2x8x16xf32>
    %73 = tpu.matmul %69, %56, %cst_46 {dimension_numbers = #tpu.dot_dimension_numbers<[2], [1], [1], [2], [0, 0, 0, 1, 1, 2], [0], [0]>} : vector<2x8x8xf32>, vector<2x8x16xf32>, vector<2x8x16xf32> -> vector<2x8x16xf32>
    "tpu.trace_stop"() : () -> ()
    %74 = vector.shape_cast %73 : vector<2x8x16xf32> to vector<16x16xf32>
    %75 = vector.extract_strided_slice %22 {offsets = [16, 0], sizes = [16, 32], strides = [1, 1]} : vector<32x32xf32> to vector<16x32xf32>
    %cst_47 = arith.constant dense<0.000000e+00> : vector<16x32xf32>
    %76 = tpu.matmul %74, %75, %cst_47 {dimension_numbers = #tpu.dot_dimension_numbers<[1], [0], [0], [1], [0, 0, 1, 1], [], []>} : vector<16x16xf32>, vector<16x32xf32>, vector<16x32xf32> -> vector<16x32xf32>
    %77 = arith.addf %53, %76 : vector<16x32xf32>
    %78 = vector.broadcast %23 : vector<1x32xf32> to vector<16x32xf32>
    %79 = arith.addf %77, %78 : vector<16x32xf32>
    %80 = arith.addf %79, %1 : vector<16x32xf32>
    %cst_48 = arith.constant dense<0.000000e+00> : vector<16xf32>
    %81 = vector.multi_reduction <add>, %80, %cst_48 [1] : vector<16x32xf32> to vector<16xf32>
    %82 = vector.shape_cast %81 : vector<16xf32> to vector<16x1xf32>
    %cst_49 = arith.constant 3.200000e+01 : f32
    %83 = vector.broadcast %cst_49 : f32 to vector<16x1xf32>
    %84 = arith.divf %82, %83 : vector<16x1xf32>
    %85 = vector.broadcast %84 : vector<16x1xf32> to vector<16x32xf32>
    %86 = arith.subf %80, %85 : vector<16x32xf32>
    %87 = arith.mulf %86, %86 : vector<16x32xf32>
    %cst_50 = arith.constant dense<0.000000e+00> : vector<16xf32>
    %88 = vector.multi_reduction <add>, %87, %cst_50 [1] : vector<16x32xf32> to vector<16xf32>
    %89 = vector.shape_cast %88 : vector<16xf32> to vector<16x1xf32>
    %cst_51 = arith.constant 3.200000e+01 : f32
    %90 = vector.broadcast %cst_51 : f32 to vector<16x1xf32>
    %91 = arith.divf %89, %90 : vector<16x1xf32>
    %92 = vector.broadcast %84 : vector<16x1xf32> to vector<16x32xf32>
    %93 = arith.subf %80, %92 : vector<16x32xf32>
    %cst_52 = arith.constant 9.99999974E-6 : f32
    %94 = vector.broadcast %cst_52 : f32 to vector<16x1xf32>
    %95 = arith.addf %91, %94 : vector<16x1xf32>
    %96 = math.rsqrt %95 : vector<16x1xf32>
    %97 = vector.broadcast %96 : vector<16x1xf32> to vector<16x32xf32>
    %98 = arith.mulf %93, %97 : vector<16x32xf32>
    %99 = vector.broadcast %24 : vector<1x32xf32> to vector<16x32xf32>
    %100 = arith.mulf %98, %99 : vector<16x32xf32>
    %101 = vector.broadcast %25 : vector<1x32xf32> to vector<16x32xf32>
    %102 = arith.addf %100, %101 : vector<16x32xf32>
    %103 = vector.broadcast %5 : vector<16x1xf32> to vector<16x32xf32>
    %104 = arith.mulf %102, %103 : vector<16x32xf32>
    %c0_53 = arith.constant 0 : index
    %c0_54 = arith.constant 0 : index
    %105 = vector.load %arg12[%c0_53, %c0_54] : memref<32x32xf32, #tpu.memory_space<vmem>>, vector<32x32xf32>
    %cst_55 = arith.constant dense<0.000000e+00> : vector<16x32xf32>
    %106 = tpu.matmul %104, %105, %cst_55 {dimension_numbers = #tpu.dot_dimension_numbers<[1], [0], [0], [1], [0, 0, 1, 1], [], []>} : vector<16x32xf32>, vector<32x32xf32>, vector<16x32xf32> -> vector<16x32xf32>
    %c0_56 = arith.constant 0 : index
    %c0_57 = arith.constant 0 : index
    %107 = vector.load %arg13[%c0_56, %c0_57] : memref<1x32xf32, #tpu.memory_space<vmem>>, vector<1x32xf32>
    %108 = vector.broadcast %107 : vector<1x32xf32> to vector<16x32xf32>
    %109 = arith.addf %106, %108 : vector<16x32xf32>
    %c0_58 = arith.constant 0 : index
    %c0_59 = arith.constant 0 : index
    %110 = vector.load %arg14[%c0_58, %c0_59] : memref<32x64xf32, #tpu.memory_space<vmem>>, vector<32x64xf32>
    %cst_60 = arith.constant dense<0.000000e+00> : vector<32x64xf32>
    %111 = tpu.matmul %3, %110, %cst_60 {dimension_numbers = #tpu.dot_dimension_numbers<[1], [0], [0], [1], [0, 0, 1, 1], [], []>} : vector<32x32xf32>, vector<32x64xf32>, vector<32x64xf32> -> vector<32x64xf32>
    %c0_61 = arith.constant 0 : index
    %c0_62 = arith.constant 0 : index
    %112 = vector.load %arg15[%c0_61, %c0_62] : memref<1x64xf32, #tpu.memory_space<vmem>>, vector<1x64xf32>
    %113 = vector.broadcast %112 : vector<1x64xf32> to vector<32x64xf32>
    %114 = arith.addf %111, %113 : vector<32x64xf32>
    %115 = vector.extract_strided_slice %114 {offsets = [0, 0], sizes = [32, 32], strides = [1, 1]} : vector<32x64xf32> to vector<32x32xf32>
    %116 = vector.extract_strided_slice %114 {offsets = [0, 32], sizes = [32, 32], strides = [1, 1]} : vector<32x64xf32> to vector<32x32xf32>
    %c0_63 = arith.constant 0 : index
    %c0_64 = arith.constant 0 : index
    %117 = vector.load %arg16[%c0_63, %c0_64] : memref<32x32xf32, #tpu.memory_space<vmem>>, vector<32x32xf32>
    %c0_65 = arith.constant 0 : index
    %c0_66 = arith.constant 0 : index
    %118 = vector.load %arg17[%c0_65, %c0_66] : memref<1x32xf32, #tpu.memory_space<vmem>>, vector<1x32xf32>
    %c0_67 = arith.constant 0 : index
    %c0_68 = arith.constant 0 : index
    %119 = vector.load %arg18[%c0_67, %c0_68] : memref<1x32xf32, #tpu.memory_space<vmem>>, vector<1x32xf32>
    %c0_69 = arith.constant 0 : index
    %c0_70 = arith.constant 0 : index
    %120 = vector.load %arg19[%c0_69, %c0_70] : memref<1x32xf32, #tpu.memory_space<vmem>>, vector<1x32xf32>
    %121 = vector.shape_cast %109 : vector<16x32xf32> to vector<2x8x32xf32>
    %122 = vector.shape_cast %115 : vector<32x32xf32> to vector<2x16x32xf32>
    %123 = vector.shape_cast %116 : vector<32x32xf32> to vector<2x16x32xf32>
    %cst_71 = arith.constant 0.000000e+00 : f32
    %124 = vector.broadcast %cst_71 : f32 to vector<16x32xf32>
    %125 = vector.extract_strided_slice %121 {offsets = [0, 0, 0], sizes = [2, 8, 16], strides = [1, 1, 1]} : vector<2x8x32xf32> to vector<2x8x16xf32>
    %126 = vector.extract_strided_slice %122 {offsets = [0, 0, 0], sizes = [2, 16, 16], strides = [1, 1, 1]} : vector<2x16x32xf32> to vector<2x16x16xf32>
    %127 = vector.extract_strided_slice %123 {offsets = [0, 0, 0], sizes = [2, 16, 16], strides = [1, 1, 1]} : vector<2x16x32xf32> to vector<2x16x16xf32>
    "tpu.trace_start"() <{level = 10 : i32, message = "bqd,bkd->bqk"}> : () -> ()
    %cst_72 = arith.constant dense<0.000000e+00> : vector<2x8x16xf32>
    %128 = tpu.matmul %125, %126, %cst_72 {dimension_numbers = #tpu.dot_dimension_numbers<[2], [2], [1], [1], [0, 0, 0, 1, 1, 1], [0], [0]>} : vector<2x8x16xf32>, vector<2x16x16xf32>, vector<2x8x16xf32> -> vector<2x8x16xf32>
    %cst_73 = arith.constant 0xFF800000 : f32
    "tpu.trace_stop"() : () -> ()
    %129 = vector.broadcast %cst_73 : f32 to vector<2x8x16xf32>
    %130 = arith.select %13, %129, %128 : vector<2x8x16xi1>, vector<2x8x16xf32>
    %cst_74 = arith.constant dense<0xFF800000> : vector<2x8xf32>
    %131 = vector.multi_reduction <maximumf>, %130, %cst_74 [2] : vector<2x8x16xf32> to vector<2x8xf32>
    %132 = vector.shape_cast %131 : vector<2x8xf32> to vector<2x8x1xf32>
    %133 = vector.broadcast %132 : vector<2x8x1xf32> to vector<2x8x16xf32>
    %134 = arith.subf %130, %133 : vector<2x8x16xf32>
    %135 = math.exp %134 : vector<2x8x16xf32>
    %cst_75 = arith.constant dense<0.000000e+00> : vector<2x8xf32>
    %136 = vector.multi_reduction <add>, %135, %cst_75 [2] : vector<2x8x16xf32> to vector<2x8xf32>
    %137 = vector.shape_cast %136 : vector<2x8xf32> to vector<2x8x1xf32>
    %138 = tpu.reciprocal %137 : vector<2x8x1xf32> -> vector<2x8x1xf32>
    %139 = vector.broadcast %138 : vector<2x8x1xf32> to vector<2x8x16xf32>
    %140 = arith.mulf %135, %139 : vector<2x8x16xf32>
    %c0_76 = arith.constant 0 : index
    %c0_77 = arith.constant 0 : index
    %c0_78 = arith.constant 0 : index
    %c0_79 = arith.constant 0 : index
    %141 = vector.load %arg28[%c0_76, %c0_77, %c0_78, %c0_79] : memref<2x2x8x16xf32, #tpu.memory_space<vmem>>, vector<2x1x8x16xf32>
    %142 = vector.shape_cast %141 : vector<2x1x8x16xf32> to vector<2x8x16xf32>
    %143 = vector.shape_cast %140 : vector<2x8x16xf32> to vector<2x1x8x16xf32>
    tpu.vector_store %arg28[%c0_76, %c0_77, %c0_78, %c0_79], %143 {strides = array<i32>} : memref<2x2x8x16xf32, #tpu.memory_space<vmem>>, vector<2x1x8x16xf32>,
    "tpu.trace_start"() <{level = 10 : i32, message = "bqk,bkd->bqd"}> : () -> ()
    %cst_80 = arith.constant dense<0.000000e+00> : vector<2x8x16xf32>
    %144 = tpu.matmul %140, %127, %cst_80 {dimension_numbers = #tpu.dot_dimension_numbers<[2], [1], [1], [2], [0, 0, 0, 1, 1, 2], [0], [0]>} : vector<2x8x16xf32>, vector<2x16x16xf32>, vector<2x8x16xf32> -> vector<2x8x16xf32>
    "tpu.trace_stop"() : () -> ()
    %145 = vector.shape_cast %144 : vector<2x8x16xf32> to vector<16x16xf32>
    %146 = vector.extract_strided_slice %117 {offsets = [0, 0], sizes = [16, 32], strides = [1, 1]} : vector<32x32xf32> to vector<16x32xf32>
    %cst_81 = arith.constant dense<0.000000e+00> : vector<16x32xf32>
    %147 = tpu.matmul %145, %146, %cst_81 {dimension_numbers = #tpu.dot_dimension_numbers<[1], [0], [0], [1], [0, 0, 1, 1], [], []>} : vector<16x16xf32>, vector<16x32xf32>, vector<16x32xf32> -> vector<16x32xf32>
    %148 = arith.addf %124, %147 : vector<16x32xf32>
    %149 = vector.extract_strided_slice %121 {offsets = [0, 0, 16], sizes = [2, 8, 16], strides = [1, 1, 1]} : vector<2x8x32xf32> to vector<2x8x16xf32>
    %150 = vector.extract_strided_slice %122 {offsets = [0, 0, 16], sizes = [2, 16, 16], strides = [1, 1, 1]} : vector<2x16x32xf32> to vector<2x16x16xf32>
    %151 = vector.extract_strided_slice %123 {offsets = [0, 0, 16], sizes = [2, 16, 16], strides = [1, 1, 1]} : vector<2x16x32xf32> to vector<2x16x16xf32>
    "tpu.trace_start"() <{level = 10 : i32, message = "bqd,bkd->bqk"}> : () -> ()
    %cst_82 = arith.constant dense<0.000000e+00> : vector<2x8x16xf32>
    %152 = tpu.matmul %149, %150, %cst_82 {dimension_numbers = #tpu.dot_dimension_numbers<[2], [2], [1], [1], [0, 0, 0, 1, 1, 1], [0], [0]>} : vector<2x8x16xf32>, vector<2x16x16xf32>, vector<2x8x16xf32> -> vector<2x8x16xf32>
    %cst_83 = arith.constant 0xFF800000 : f32
    "tpu.trace_stop"() : () -> ()
    %153 = vector.broadcast %cst_83 : f32 to vector<2x8x16xf32>
    %154 = arith.select %13, %153, %152 : vector<2x8x16xi1>, vector<2x8x16xf32>
    %cst_84 = arith.constant dense<0xFF800000> : vector<2x8xf32>
    %155 = vector.multi_reduction <maximumf>, %154, %cst_84 [2] : vector<2x8x16xf32> to vector<2x8xf32>
    %156 = vector.shape_cast %155 : vector<2x8xf32> to vector<2x8x1xf32>
    %157 = vector.broadcast %156 : vector<2x8x1xf32> to vector<2x8x16xf32>
    %158 = arith.subf %154, %157 : vector<2x8x16xf32>
    %159 = math.exp %158 : vector<2x8x16xf32>
    %cst_85 = arith.constant dense<0.000000e+00> : vector<2x8xf32>
    %160 = vector.multi_reduction <add>, %159, %cst_85 [2] : vector<2x8x16xf32> to vector<2x8xf32>
    %161 = vector.shape_cast %160 : vector<2x8xf32> to vector<2x8x1xf32>
    %162 = tpu.reciprocal %161 : vector<2x8x1xf32> -> vector<2x8x1xf32>
    %163 = vector.broadcast %162 : vector<2x8x1xf32> to vector<2x8x16xf32>
    %164 = arith.mulf %159, %163 : vector<2x8x16xf32>
    %c0_86 = arith.constant 0 : index
    %c1_87 = arith.constant 1 : index
    %c0_88 = arith.constant 0 : index
    %c0_89 = arith.constant 0 : index
    %165 = vector.load %arg28[%c0_86, %c1_87, %c0_88, %c0_89] : memref<2x2x8x16xf32, #tpu.memory_space<vmem>>, vector<2x1x8x16xf32>
    %166 = vector.shape_cast %165 : vector<2x1x8x16xf32> to vector<2x8x16xf32>
    %167 = vector.shape_cast %164 : vector<2x8x16xf32> to vector<2x1x8x16xf32>
    tpu.vector_store %arg28[%c0_86, %c1_87, %c0_88, %c0_89], %167 {strides = array<i32>} : memref<2x2x8x16xf32, #tpu.memory_space<vmem>>, vector<2x1x8x16xf32>,
    "tpu.trace_start"() <{level = 10 : i32, message = "bqk,bkd->bqd"}> : () -> ()
    %cst_90 = arith.constant dense<0.000000e+00> : vector<2x8x16xf32>
    %168 = tpu.matmul %164, %151, %cst_90 {dimension_numbers = #tpu.dot_dimension_numbers<[2], [1], [1], [2], [0, 0, 0, 1, 1, 2], [0], [0]>} : vector<2x8x16xf32>, vector<2x16x16xf32>, vector<2x8x16xf32> -> vector<2x8x16xf32>
    "tpu.trace_stop"() : () -> ()
    %169 = vector.shape_cast %168 : vector<2x8x16xf32> to vector<16x16xf32>
    %170 = vector.extract_strided_slice %117 {offsets = [16, 0], sizes = [16, 32], strides = [1, 1]} : vector<32x32xf32> to vector<16x32xf32>
    %cst_91 = arith.constant dense<0.000000e+00> : vector<16x32xf32>
    %171 = tpu.matmul %169, %170, %cst_91 {dimension_numbers = #tpu.dot_dimension_numbers<[1], [0], [0], [1], [0, 0, 1, 1], [], []>} : vector<16x16xf32>, vector<16x32xf32>, vector<16x32xf32> -> vector<16x32xf32>
    %172 = arith.addf %148, %171 : vector<16x32xf32>
    %173 = vector.broadcast %118 : vector<1x32xf32> to vector<16x32xf32>
    %174 = arith.addf %172, %173 : vector<16x32xf32>
    %175 = arith.addf %174, %104 : vector<16x32xf32>
    %cst_92 = arith.constant dense<0.000000e+00> : vector<16xf32>
    %176 = vector.multi_reduction <add>, %175, %cst_92 [1] : vector<16x32xf32> to vector<16xf32>
    %177 = vector.shape_cast %176 : vector<16xf32> to vector<16x1xf32>
    %cst_93 = arith.constant 3.200000e+01 : f32
    %178 = vector.broadcast %cst_93 : f32 to vector<16x1xf32>
    %179 = arith.divf %177, %178 : vector<16x1xf32>
    %180 = vector.broadcast %179 : vector<16x1xf32> to vector<16x32xf32>
    %181 = arith.subf %175, %180 : vector<16x32xf32>
    %182 = arith.mulf %181, %181 : vector<16x32xf32>
    %cst_94 = arith.constant dense<0.000000e+00> : vector<16xf32>
    %183 = vector.multi_reduction <add>, %182, %cst_94 [1] : vector<16x32xf32> to vector<16xf32>
    %184 = vector.shape_cast %183 : vector<16xf32> to vector<16x1xf32>
    %cst_95 = arith.constant 3.200000e+01 : f32
    %185 = vector.broadcast %cst_95 : f32 to vector<16x1xf32>
    %186 = arith.divf %184, %185 : vector<16x1xf32>
    %187 = vector.broadcast %179 : vector<16x1xf32> to vector<16x32xf32>
    %188 = arith.subf %175, %187 : vector<16x32xf32>
    %cst_96 = arith.constant 9.99999974E-6 : f32
    %189 = vector.broadcast %cst_96 : f32 to vector<16x1xf32>
    %190 = arith.addf %186, %189 : vector<16x1xf32>
    %191 = math.rsqrt %190 : vector<16x1xf32>
    %192 = vector.broadcast %191 : vector<16x1xf32> to vector<16x32xf32>
    %193 = arith.mulf %188, %192 : vector<16x32xf32>
    %194 = vector.broadcast %119 : vector<1x32xf32> to vector<16x32xf32>
    %195 = arith.mulf %193, %194 : vector<16x32xf32>
    %196 = vector.broadcast %120 : vector<1x32xf32> to vector<16x32xf32>
    %197 = arith.addf %195, %196 : vector<16x32xf32>
    %198 = vector.broadcast %5 : vector<16x1xf32> to vector<16x32xf32>
    %199 = arith.mulf %197, %198 : vector<16x32xf32>
    %c0_97 = arith.constant 0 : index
    %c0_98 = arith.constant 0 : index
    %200 = vector.load %arg20[%c0_97, %c0_98] : memref<32x64xf32, #tpu.memory_space<vmem>>, vector<32x64xf32>
    %cst_99 = arith.constant dense<0.000000e+00> : vector<16x64xf32>
    %201 = tpu.matmul %199, %200, %cst_99 {dimension_numbers = #tpu.dot_dimension_numbers<[1], [0], [0], [1], [0, 0, 1, 1], [], []>} : vector<16x32xf32>, vector<32x64xf32>, vector<16x64xf32> -> vector<16x64xf32>
    %c0_100 = arith.constant 0 : index
    %c0_101 = arith.constant 0 : index
    %202 = vector.load %arg21[%c0_100, %c0_101] : memref<1x64xf32, #tpu.memory_space<vmem>>, vector<1x64xf32>
    %203 = vector.broadcast %202 : vector<1x64xf32> to vector<16x64xf32>
    %204 = arith.addf %201, %203 : vector<16x64xf32>
    %cst_102 = arith.constant 0.000000e+00 : f32
    %205 = vector.broadcast %cst_102 : f32 to vector<16x64xf32>
    %206 = arith.maximumf %204, %205 : vector<16x64xf32>
    %c0_103 = arith.constant 0 : index
    %c0_104 = arith.constant 0 : index
    %207 = vector.load %arg22[%c0_103, %c0_104] : memref<64x32xf32, #tpu.memory_space<vmem>>, vector<64x32xf32>
    %cst_105 = arith.constant dense<0.000000e+00> : vector<16x32xf32>
    %208 = tpu.matmul %206, %207, %cst_105 {dimension_numbers = #tpu.dot_dimension_numbers<[1], [0], [0], [1], [0, 0, 1, 1], [], []>} : vector<16x64xf32>, vector<64x32xf32>, vector<16x32xf32> -> vector<16x32xf32>
    %c0_106 = arith.constant 0 : index
    %c0_107 = arith.constant 0 : index
    %209 = vector.load %arg23[%c0_106, %c0_107] : memref<1x32xf32, #tpu.memory_space<vmem>>, vector<1x32xf32>
    %210 = vector.broadcast %209 : vector<1x32xf32> to vector<16x32xf32>
    %211 = arith.addf %208, %210 : vector<16x32xf32>
    %212 = arith.addf %211, %199 : vector<16x32xf32>
    %c0_108 = arith.constant 0 : index
    %c0_109 = arith.constant 0 : index
    %213 = vector.load %arg24[%c0_108, %c0_109] : memref<1x32xf32, #tpu.memory_space<vmem>>, vector<1x32xf32>
    %c0_110 = arith.constant 0 : index
    %c0_111 = arith.constant 0 : index
    %214 = vector.load %arg25[%c0_110, %c0_111] : memref<1x32xf32, #tpu.memory_space<vmem>>, vector<1x32xf32>
    %cst_112 = arith.constant dense<0.000000e+00> : vector<16xf32>
    %215 = vector.multi_reduction <add>, %212, %cst_112 [1] : vector<16x32xf32> to vector<16xf32>
    %216 = vector.shape_cast %215 : vector<16xf32> to vector<16x1xf32>
    %cst_113 = arith.constant 3.200000e+01 : f32
    %217 = vector.broadcast %cst_113 : f32 to vector<16x1xf32>
    %218 = arith.divf %216, %217 : vector<16x1xf32>
    %219 = vector.broadcast %218 : vector<16x1xf32> to vector<16x32xf32>
    %220 = arith.subf %212, %219 : vector<16x32xf32>
    %221 = arith.mulf %220, %220 : vector<16x32xf32>
    %cst_114 = arith.constant dense<0.000000e+00> : vector<16xf32>
    %222 = vector.multi_reduction <add>, %221, %cst_114 [1] : vector<16x32xf32> to vector<16xf32>
    %223 = vector.shape_cast %222 : vector<16xf32> to vector<16x1xf32>
    %cst_115 = arith.constant 3.200000e+01 : f32
    %224 = vector.broadcast %cst_115 : f32 to vector<16x1xf32>
    %225 = arith.divf %223, %224 : vector<16x1xf32>
    %226 = vector.broadcast %218 : vector<16x1xf32> to vector<16x32xf32>
    %227 = arith.subf %212, %226 : vector<16x32xf32>
    %cst_116 = arith.constant 9.99999974E-6 : f32
    %228 = vector.broadcast %cst_116 : f32 to vector<16x1xf32>
    %229 = arith.addf %225, %228 : vector<16x1xf32>
    %230 = math.rsqrt %229 : vector<16x1xf32>
    %231 = vector.broadcast %230 : vector<16x1xf32> to vector<16x32xf32>
    %232 = arith.mulf %227, %231 : vector<16x32xf32>
    %233 = vector.broadcast %213 : vector<1x32xf32> to vector<16x32xf32>
    %234 = arith.mulf %232, %233 : vector<16x32xf32>
    %235 = vector.broadcast %214 : vector<1x32xf32> to vector<16x32xf32>
    %236 = arith.addf %234, %235 : vector<16x32xf32>
    %237 = vector.broadcast %5 : vector<16x1xf32> to vector<16x32xf32>
    %238 = arith.mulf %236, %237 : vector<16x32xf32>
    %239 = vector.shape_cast %238 : vector<16x32xf32> to vector<2x8x32xf32>
    %c0_117 = arith.constant 0 : index
    %c0_118 = arith.constant 0 : index
    %c0_119 = arith.constant 0 : index
    %240 = vector.load %arg26[%c0_117, %c0_118, %c0_119] : memref<2x8x32xf32, #tpu.memory_space<vmem>>, vector<2x8x32xf32>
    tpu.vector_store %arg26[%c0_117, %c0_118, %c0_119], %239 {strides = array<i32>} : memref<2x8x32xf32, #tpu.memory_space<vmem>>, vector<2x8x32xf32>,
    return
  }
  func.func @transform_0(%arg0: i32) -> (i32, i32, i32) {
    %c0_i32 = arith.constant 0 : i32
    %c0_i32_0 = arith.constant 0 : i32
    %c0_i32_1 = arith.constant 0 : i32
    return %arg0, %c0_i32, %c0_i32_0 : i32, i32, i32
  }
  func.func @transform_1(%arg0: i32) -> (i32, i32, i32) {
    %c0_i32 = arith.constant 0 : i32
    %c0_i32_0 = arith.constant 0 : i32
    %c0_i32_1 = arith.constant 0 : i32
    return %arg0, %c0_i32, %c0_i32_0 : i32, i32, i32
  }
  func.func @transform_2(%arg0: i32) -> (i32, i32, i32) {
    %c0_i32 = arith.constant 0 : i32
    %c0_i32_0 = arith.constant 0 : i32
    %c0_i32_1 = arith.constant 0 : i32
    return %arg0, %c0_i32, %c0_i32_0 : i32, i32, i32
  }
  func.func @transform_3(%arg0: i32) -> (i32, i32, i32) {
    %c0_i32 = arith.constant 0 : i32
    %c0_i32_0 = arith.constant 0 : i32
    %c0_i32_1 = arith.constant 0 : i32
    return %arg0, %c0_i32, %c0_i32_0 : i32, i32, i32
  }
  func.func @transform_4(%arg0: i32) -> (i32, i32, i32) {
    %c0_i32 = arith.constant 0 : i32
    %c0_i32_0 = arith.constant 0 : i32
    %c0_i32_1 = arith.constant 0 : i32
    return %arg0, %c0_i32, %c0_i32_0 : i32, i32, i32
  }
  func.func @transform_5(%arg0: i32) -> (i32, i32) {
    %c0_i32 = arith.constant 0 : i32
    %c0_i32_0 = arith.constant 0 : i32
    %c0_i32_1 = arith.constant 0 : i32
    return %c0_i32, %c0_i32_0 : i32, i32
  }
  func.func @transform_6(%arg0: i32) -> (i32, i32) {
    %c0_i32 = arith.constant 0 : i32
    %c0_i32_0 = arith.constant 0 : i32
    %c0_i32_1 = arith.constant 0 : i32
    return %c0_i32, %c0_i32_0 : i32, i32
  }
  func.func @transform_7(%arg0: i32) -> (i32, i32) {
    %c0_i32 = arith.constant 0 : i32
    %c0_i32_0 = arith.constant 0 : i32
    %c0_i32_1 = arith.constant 0 : i32
    return %c0_i32, %c0_i32_0 : i32, i32
  }
  func.func @transform_8(%arg0: i32) -> (i32, i32) {
    %c0_i32 = arith.constant 0 : i32
    %c0_i32_0 = arith.constant 0 : i32
    %c0_i32_1 = arith.constant 0 : i32
    return %c0_i32, %c0_i32_0 : i32, i32
  }
  func.func @transform_9(%arg0: i32) -> (i32, i32) {
    %c0_i32 = arith.constant 0 : i32
    %c0_i32_0 = arith.constant 0 : i32
    %c0_i32_1 = arith.constant 0 : i32
    return %c0_i32, %c0_i32_0 : i32, i32
  }
  func.func @transform_10(%arg0: i32) -> (i32, i32) {
    %c0_i32 = arith.constant 0 : i32
    %c0_i32_0 = arith.constant 0 : i32
    %c0_i32_1 = arith.constant 0 : i32
    return %c0_i32, %c0_i32_0 : i32, i32
  }
  func.func @transform_11(%arg0: i32) -> (i32, i32) {
    %c0_i32 = arith.constant 0 : i32
    %c0_i32_0 = arith.constant 0 : i32
    %c0_i32_1 = arith.constant 0 : i32
    return %c0_i32, %c0_i32_0 : i32, i32
  }
  func.func @transform_12(%arg0: i32) -> (i32, i32) {
    %c0_i32 = arith.constant 0 : i32
    %c0_i32_0 = arith.constant 0 : i32
    %c0_i32_1 = arith.constant 0 : i32
    return %c0_i32, %c0_i32_0 : i32, i32
  }
  func.func @transform_13(%arg0: i32) -> (i32, i32) {
    %c0_i32 = arith.constant 0 : i32
    %c0_i32_0 = arith.constant 0 : i32
    %c0_i32_1 = arith.constant 0 : i32
    return %c0_i32, %c0_i32_0 : i32, i32
  }
  func.func @transform_14(%arg0: i32) -> (i32, i32) {
    %c0_i32 = arith.constant 0 : i32
    %c0_i32_0 = arith.constant 0 : i32
    %c0_i32_1 = arith.constant 0 : i32
    return %c0_i32, %c0_i32_0 : i32, i32
  }
  func.func @transform_15(%arg0: i32) -> (i32, i32) {
    %c0_i32 = arith.constant 0 : i32
    %c0_i32_0 = arith.constant 0 : i32
    %c0_i32_1 = arith.constant 0 : i32
    return %c0_i32, %c0_i32_0 : i32, i32
  }
  func.func @transform_16(%arg0: i32) -> (i32, i32) {
    %c0_i32 = arith.constant 0 : i32
    %c0_i32_0 = arith.constant 0 : i32
    %c0_i32_1 = arith.constant 0 : i32
    return %c0_i32, %c0_i32_0 : i32, i32
  }
  func.func @transform_17(%arg0: i32) -> (i32, i32) {
    %c0_i32 = arith.constant 0 : i32
    %c0_i32_0 = arith.constant 0 : i32
    %c0_i32_1 = arith.constant 0 : i32
    return %c0_i32, %c0_i32_0 : i32, i32
  }
  func.func @transform_18(%arg0: i32) -> (i32, i32) {
    %c0_i32 = arith.constant 0 : i32
    %c0_i32_0 = arith.constant 0 : i32
    %c0_i32_1 = arith.constant 0 : i32
    return %c0_i32, %c0_i32_0 : i32, i32
  }
  func.func @transform_19(%arg0: i32) -> (i32, i32) {
    %c0_i32 = arith.constant 0 : i32
    %c0_i32_0 = arith.constant 0 : i32
    %c0_i32_1 = arith.constant 0 : i32
    return %c0_i32, %c0_i32_0 : i32, i32
  }
  func.func @transform_20(%arg0: i32) -> (i32, i32) {
    %c0_i32 = arith.constant 0 : i32
    %c0_i32_0 = arith.constant 0 : i32
    %c0_i32_1 = arith.constant 0 : i32
    return %c0_i32, %c0_i32_0 : i32, i32
  }
  func.func @transform_21(%arg0: i32) -> (i32, i32) {
    %c0_i32 = arith.constant 0 : i32
    %c0_i32_0 = arith.constant 0 : i32
    %c0_i32_1 = arith.constant 0 : i32
    return %c0_i32, %c0_i32_0 : i32, i32
  }
  func.func @transform_22(%arg0: i32) -> (i32, i32) {
    %c0_i32 = arith.constant 0 : i32
    %c0_i32_0 = arith.constant 0 : i32
    %c0_i32_1 = arith.constant 0 : i32
    return %c0_i32, %c0_i32_0 : i32, i32
  }
  func.func @transform_23(%arg0: i32) -> (i32, i32) {
    %c0_i32 = arith.constant 0 : i32
    %c0_i32_0 = arith.constant 0 : i32
    %c0_i32_1 = arith.constant 0 : i32
    return %c0_i32, %c0_i32_0 : i32, i32
  }
  func.func @transform_24(%arg0: i32) -> (i32, i32) {
    %c0_i32 = arith.constant 0 : i32
    %c0_i32_0 = arith.constant 0 : i32
    %c0_i32_1 = arith.constant 0 : i32
    return %c0_i32, %c0_i32_0 : i32, i32
  }
  func.func @transform_25(%arg0: i32) -> (i32, i32, i32) {
    %c0_i32 = arith.constant 0 : i32
    %c0_i32_0 = arith.constant 0 : i32
    %c0_i32_1 = arith.constant 0 : i32
    return %arg0, %c0_i32, %c0_i32_0 : i32, i32, i32
  }
  func.func @transform_26(%arg0: i32) -> (i32, i32, i32, i32) {
    %c0_i32 = arith.constant 0 : i32
    %c0_i32_0 = arith.constant 0 : i32
    %c0_i32_1 = arith.constant 0 : i32
    %c0_i32_2 = arith.constant 0 : i32
    return %arg0, %c0_i32, %c0_i32_0, %c0_i32_1 : i32, i32, i32, i32
  }
  func.func @transform_27(%arg0: i32) -> (i32, i32, i32, i32) {
    %c0_i32 = arith.constant 0 : i32
    %c0_i32_0 = arith.constant 0 : i32
    %c0_i32_1 = arith.constant 0 : i32
    %c0_i32_2 = arith.constant 0 : i32
    return %arg0, %c0_i32, %c0_i32_0, %c0_i32_1 : i32, i32, i32, i32
  }
}

</mosaic_0001>

<bundles_post_ra>
// kernel: tpu_custom_call.1
= control target key start
LH: loop header
LB: loop body
LE: loop exit
PB: predicated region body
PF: predicated region fallthrough
CT: control target
= control target key end

     0   :  { %s4884_s0 = inlined_call_operand.hbm [shape: f32[2,8,32], index: 0, kind: input, shape index: {}]   ;;  %s4885_s1 = inlined_call_operand.hbm [shape: f32[2,16,32], index: 1, kind: input, shape index: {}]   ;;  %s4886_s2 = inlined_call_operand.hbm [shape: f32[2,8,1], index: 2, kind: input, shape index: {}]   ;;  %s4887_s3 = inlined_call_operand.hbm [shape: s8[2,8,8], index: 3, kind: input, shape index: {}]   ;;  %s4888_s4 = inlined_call_operand.hbm [shape: s8[2,8,16], index: 4, kind: input, shape index: {}]   ;;  %s4889_s5 = inlined_call_operand.hbm [shape: f32[32,96], index: 5, kind: input, shape index: {}]   ;;  %s4890_s6 = inlined_call_operand.hbm [shape: f32[1,96], index: 6, kind: input, shape index: {}]   ;;  %s4891_s7 = inlined_call_operand.hbm [shape: f32[32,32], index: 7, kind: input, shape index: {}]   ;;  %s4892_s8 = inlined_call_operand.hbm [shape: f32[1,32], index: 8, kind: input, shape index: {}]   ;;  %s4893_s9 = inlined_call_operand.hbm [shape: f32[1,32], index: 9, kind: input, shape index: {}]   ;;  %s4894_s10 = inlined_call_operand.hbm [shape: f32[1,32], index: 10, kind: input, shape index: {}]   ;;  %s4895_s11 = inlined_call_operand.hbm [shape: f32[32,32], index: 11, kind: input, shape index: {}]   ;;  %s4896_s12 = inlined_call_operand.hbm [shape: f32[1,32], index: 12, kind: input, shape index: {}]   ;;  %s4897_s13 = inlined_call_operand.hbm [shape: f32[32,64], index: 13, kind: input, shape index: {}]   ;;  %s4898_s14 = inlined_call_operand.hbm [shape: f32[1,64], index: 14, kind: input, shape index: {}]   ;;  %s4899_s15 = inlined_call_operand.hbm [shape: f32[32,32], index: 15, kind: input, shape index: {}]   ;;  %s4900_s16 = inlined_call_operand.hbm [shape: f32[1,32], index: 16, kind: input, shape index: {}]   ;;  %s4901_s17 = inlined_call_operand.hbm [shape: f32[1,32], index: 17, kind: input, shape index: {}]   ;;  %s4902_s18 = inlined_call_operand.hbm [shape: f32[1,32], index: 18, kind: input, shape index: {}]   ;;  %s4903_s19 = inlined_call_operand.hbm [shape: f32[32,64], index: 19, kind: input, shape index: {}]   ;;  %s4904_s20 = inlined_call_operand.hbm [shape: f32[1,64], index: 20, kind: input, shape index: {}]   ;;  %s4905_s21 = inlined_call_operand.hbm [shape: f32[64,32], index: 21, kind: input, shape index: {}]   ;;  %s4906_s22 = inlined_call_operand.hbm [shape: f32[1,32], index: 22, kind: input, shape index: {}]   ;;  %s4907_s23 = inlined_call_operand.hbm [shape: f32[1,32], index: 23, kind: input, shape index: {}]   ;;  %s4908_s24 = inlined_call_operand.hbm [shape: f32[1,32], index: 24, kind: input, shape index: {}]   ;;  %s4909_s25 = inlined_call_operand.hbm [shape: f32[2,8,32], index: 25, kind: output, shape index: {0}]   ;;  %s4910_s26 = inlined_call_operand.hbm [shape: f32[2,2,8,8], index: 26, kind: output, shape index: {1}]   ;;  %s4911_s27 = inlined_call_operand.hbm [shape: f32[2,2,8,16], index: 27, kind: output, shape index: {2}]  }
   0x1   :  { %4933 = sst [smem:[#allocation60_spill]] %s4884_s0 }
   0x2   :  { %4934 = sst [smem:[#allocation61_spill]] %s4885_s1 }
   0x3   :  { %4935 = sst [smem:[#allocation62_spill]] %s4886_s2 }
   0x4   :  { %4936 = sst [smem:[#allocation63_spill]] %s4887_s3 }
   0x5   :  { %4937 = sst [smem:[#allocation64_spill]] %s4888_s4 }
   0x6   :  { %4938 = sst [smem:[#allocation65_spill]] %s4889_s5 }
   0x7   :  { %4939 = sst [smem:[#allocation66_spill]] %s4890_s6 }
   0x8   :  { %4940 = sst [smem:[#allocation67_spill]] %s4891_s7 }
   0x9   :  { %4941 = sst [smem:[#allocation68_spill]] %s4892_s8 }
   0xa   :  { %4942 = sst [smem:[#allocation69_spill]] %s4893_s9 }
   0xb   :  { %4943 = sst [smem:[#allocation70_spill]] %s4894_s10 }
   0xc   :  { %4944 = sst [smem:[#allocation71_spill]] %s4895_s11 }
   0xd   :  { %4945 = sst [smem:[#allocation72_spill]] %s4909_s25 }
   0xe   :  { %4946 = sst [smem:[#allocation73_spill]] %s4910_s26 }
   0xf   :  { %4947 = sst [smem:[#allocation74_spill]] %s4911_s27 }
  0x10   :  { %33 = vsyncpa [#allocation3], 0 }
  0x11   :  { %34 = vsyncpa [#allocation6], 0 }
  0x12   :  { %35 = vsyncpa [#allocation9], 0 }
  0x13   :  { %36 = vsyncpa [#allocation12], 0 }
  0x14   :  { %37 = vsyncpa [#allocation15], 0 }
  0x15   :  { %38 = vsyncpa [#allocation18], 0 }
  0x16   :  { %39 = vsyncpa [#allocation21], 0 }
  0x17   :  { %40 = vsyncpa [#allocation24], 0 }
  0x18   :  { %41 = vsyncpa [#allocation27], 0 }
  0x19   :  { %42 = vsyncpa [#allocation30], 0 }
  0x1a   :  { %43 = vsyncpa [#allocation33], 0 }
  0x1b   :  { %44 = vsyncpa [#allocation36], 0 }
  0x1c   :  { %45 = vsyncpa [#allocation39], 0 }
  0x1d   :  { %46 = vsyncpa [#allocation4], 0 }
  0x1e   :  { %47 = vsyncpa [#allocation43], 0  ;;  %s4042_s7 = smov [#allocation5]   ;;  %s4043_s8 = smov [#allocation8]  }
  0x1f   :  { %s65_s4 = sshll.u32 %s4042_s7, 4  ;;  %s89_s30 = sshll.u32 %s4043_s8, 4  ;;  %s66_s4 = int_to_ptr.vmem [resolvable:$true] %s65_s4  ;;  %s4223_s30 = int_to_ptr.vmem [resolvable:$true] %s89_s30 }
  0x20   :  { %s4948_s28 = sld [smem:[#allocation61_spill]] }
  0x26   :  { %s3396_s0 = scalar_lea.hbm %s4948_s28, 512 }
  0x27   :  { %p3397_p0 = scmp.ne.s32.totalorder %s4948_s28, %s3396_s0  ;;  %p3400_p1 = scmp.lt.u32.totalorder %s3396_s0, %s4948_s28 }
  0x29   :  { %p3402_p2 = pnand %p3400_p1, %p3397_p0 }
  0x2b   :  { %3405 = shalt.err (!%p3402_p2)
}
  0x2c   :  { %s3406_s11 = scalar_lea.vmem %s66_s4, 512  ;;  %p3411_p4 = scmp.lt.s32.totalorder %s66_s4, %s66_s4 }
  0x2d   :  { %p3407_p3 = scmp.ne.s32.totalorder %s66_s4, %s3406_s11  ;;  %p3412_p5 = scmp.lt.s32.totalorder %s3406_s11, %s3406_s11 }
  0x2f   :  { %p3413_p6 = por %p3412_p5, %p3411_p4 }
  0x31   :  { %p3414_p7 = pnand %p3413_p6, %p3407_p3 }
  0x33   :  { %3417 = shalt.err (!%p3414_p7)
}
  0x34   :  { %s4925_s2 = smov 128   ;;  %s4927_s3 = smov 8  }
  0x35   :  { %71 = dma.hbm_to_vmem [thread:$0]  %s4948_s28, 512, %s66_s4, [#allocation6], %s4925_s2, %s4925_s2, %s4927_s3  }
  0x36   :  { %s4949_s0 = sld [smem:[#allocation63_spill]] }
  0x3c   :  { %s3418_s10 = scalar_lea.hbm %s4949_s0, 64 }
  0x3d   :  { %p3419_p8 = scmp.ne.s32.totalorder %s4949_s0, %s3418_s10  ;;  %p3422_p9 = scmp.lt.u32.totalorder %s3418_s10, %s4949_s0 }
  0x3f   :  { %p3424_p10 = pnand %p3422_p9, %p3419_p8 }
  0x41   :  { %3427 = shalt.err (!%p3424_p10)
}
  0x42   :  { %s3428_s25 = scalar_lea.vmem %s4223_s30, 64  ;;  %p3433_p12 = scmp.lt.s32.totalorder %s4223_s30, %s4223_s30 }
  0x43   :  { %p3429_p11 = scmp.ne.s32.totalorder %s4223_s30, %s3428_s25  ;;  %p3434_p13 = scmp.lt.s32.totalorder %s3428_s25, %s3428_s25 }
  0x45   :  { %p3435_p0 = por %p3434_p13, %p3433_p12 }
  0x47   :  { %p3436_p1 = pnand %p3435_p0, %p3429_p11 }
  0x49   :  { %3439 = shalt.err (!%p3436_p1)
}
  0x4a   :  { %s4931_s4 = smov 32   ;;  %s4932_s28 = smov 2  }
  0x4b   :  { %95 = dma.hbm_to_vmem [thread:$0]  %s4949_s0, 64, %s4223_s30, [#allocation9], %s4931_s4, %s4931_s4, %s4932_s28  }
  0x4c   :  { %s4048_s9 = smov [#allocation11]   ;;  %s4049_s10 = smov [#allocation14]  }
  0x4d   :  { %s113_s5 = sshll.u32 %s4048_s9, 4  ;;  %s135_s29 = sshll.u32 %s4049_s10, 4  ;;  %s114_s5 = int_to_ptr.vmem [resolvable:$true] %s113_s5  ;;  %s4260_s29 = int_to_ptr.vmem [resolvable:$true] %s135_s29 }
  0x4e   :  { %s4950_s6 = sld [smem:[#allocation65_spill]] }
  0x54   :  { %s3440_s11 = scalar_lea.hbm %s4950_s6, 512 }
  0x55   :  { %p3441_p2 = scmp.ne.s32.totalorder %s4950_s6, %s3440_s11  ;;  %p3444_p3 = scmp.lt.u32.totalorder %s3440_s11, %s4950_s6 }
  0x57   :  { %p3446_p4 = pnand %p3444_p3, %p3441_p2 }
  0x59   :  { %3449 = shalt.err (!%p3446_p4)
}
  0x5a   :  { %s3450_s30 = scalar_lea.vmem %s114_s5, 512  ;;  %p3455_p6 = scmp.lt.s32.totalorder %s114_s5, %s114_s5 }
  0x5b   :  { %p3451_p5 = scmp.ne.s32.totalorder %s114_s5, %s3450_s30  ;;  %p3456_p7 = scmp.lt.s32.totalorder %s3450_s30, %s3450_s30 }
  0x5d   :  { %p3457_p8 = por %p3456_p7, %p3455_p6 }
  0x5f   :  { %p3458_p9 = pnand %p3457_p8, %p3451_p5 }
  0x61   :  { %3461 = shalt.err (!%p3458_p9)
}
  0x62   :  { %s4951_s0 = smov 8   ;;  %s4952_s7 = smov 128  }
  0x63   :  { %119 = dma.hbm_to_vmem [thread:$0]  %s4950_s6, 512, %s114_s5, [#allocation12], %s4952_s7, %s4952_s7, %s4951_s0  }
  0x64   :  { %s4953_s26 = sld [smem:[#allocation67_spill]] }
  0x6a   :  { %s3462_s27 = scalar_lea.hbm %s4953_s26, 512 }
  0x6b   :  { %p3463_p10 = scmp.ne.s32.totalorder %s4953_s26, %s3462_s27  ;;  %p3466_p11 = scmp.lt.u32.totalorder %s3462_s27, %s4953_s26 }
  0x6d   :  { %p3468_p12 = pnand %p3466_p11, %p3463_p10 }
  0x6f   :  { %3471 = shalt.err (!%p3468_p12)
}
  0x70   :  { %s3472_s30 = scalar_lea.vmem %s4260_s29, 512  ;;  %p3477_p0 = scmp.lt.s32.totalorder %s4260_s29, %s4260_s29 }
  0x71   :  { %p3473_p13 = scmp.ne.s32.totalorder %s4260_s29, %s3472_s30  ;;  %p3478_p1 = scmp.lt.s32.totalorder %s3472_s30, %s3472_s30 }
  0x73   :  { %p3479_p2 = por %p3478_p1, %p3477_p0 }
  0x75   :  { %p3480_p3 = pnand %p3479_p2, %p3473_p13 }
  0x77   :  { %3483 = shalt.err (!%p3480_p3)
}
  0x78   :  { %141 = dma.hbm_to_vmem [thread:$0]  %s4953_s26, 512, %s4260_s29, [#allocation15], %s4952_s7, %s4952_s7, %s4951_s0  }
  0x79   :  { %s4050_s8 = smov [#allocation17]   ;;  %s4051_s2 = smov [#allocation20]  }
  0x7a   :  { %s158_s9 = sshll.u32 %s4050_s8, 4  ;;  %s177_s3 = sshll.u32 %s4051_s2, 4  ;;  %s159_s9 = int_to_ptr.vmem [resolvable:$true] %s158_s9  ;;  %s4297_s3 = int_to_ptr.vmem [resolvable:$true] %s177_s3 }
  0x7b   :  { %s4954_s25 = sld [smem:[#allocation69_spill]] }
  0x81   :  { %s3484_s1 = scalar_lea.hbm %s4954_s25, 16 }
  0x82   :  { %p3485_p4 = scmp.ne.s32.totalorder %s4954_s25, %s3484_s1  ;;  %p3488_p5 = scmp.lt.u32.totalorder %s3484_s1, %s4954_s25 }
  0x84   :  { %p3490_p6 = pnand %p3488_p5, %p3485_p4 }
  0x86   :  { %3493 = shalt.err (!%p3490_p6)
}
  0x87   :  { %s3494_s29 = scalar_lea.vmem %s159_s9, 16  ;;  %s3498_s26 = scalar_lea.vmem %s159_s9, 32 }
  0x88   :  { %p3495_p7 = scmp.ne.s32.totalorder %s159_s9, %s3494_s29  ;;  %p3499_p8 = scmp.lt.s32.totalorder %s159_s9, %s159_s9 }
  0x89   :  { %p3500_p9 = scmp.lt.s32.totalorder %s3498_s26, %s3494_s29 }
  0x8b   :  { %p3501_p10 = por %p3500_p9, %p3499_p8 }
  0x8d   :  { %p3502_p11 = pnand %p3501_p10, %p3495_p7 }
  0x8f   :  { %3505 = shalt.err (!%p3502_p11)
}
  0x90   :  { %161 = dma.hbm_to_vmem [thread:$0]  %s4954_s25, 16, %s159_s9, [#allocation18]  }
  0x91   :  { %s4955_s27 = sld [smem:[#allocation71_spill]] }
  0x97   :  { %s3506_s10 = scalar_lea.hbm %s4955_s27, 512 }
  0x98   :  { %p3507_p12 = scmp.ne.s32.totalorder %s4955_s27, %s3506_s10  ;;  %p3510_p13 = scmp.lt.u32.totalorder %s3506_s10, %s4955_s27 }
  0x9a   :  { %p3512_p0 = pnand %p3510_p13, %p3507_p12 }
  0x9c   :  { %3515 = shalt.err (!%p3512_p0)
}
  0x9d   :  { %s3516_s30 = scalar_lea.vmem %s4297_s3, 512  ;;  %p3521_p2 = scmp.lt.s32.totalorder %s4297_s3, %s4297_s3 }
  0x9e   :  { %p3517_p1 = scmp.ne.s32.totalorder %s4297_s3, %s3516_s30  ;;  %p3522_p3 = scmp.lt.s32.totalorder %s3516_s30, %s3516_s30 }
  0xa0   :  { %p3523_p4 = por %p3522_p3, %p3521_p2 }
  0xa2   :  { %p3524_p5 = pnand %p3523_p4, %p3517_p1 }
  0xa4   :  { %3527 = shalt.err (!%p3524_p5)
}
  0xa5   :  { %183 = dma.hbm_to_vmem [thread:$0]  %s4955_s27, 512, %s4297_s3, [#allocation21], %s4952_s7, %s4952_s7, %s4951_s0  }
  0xa6   :  { %s4052_s29 = smov [#allocation23]   ;;  %s4053_s5 = smov [#allocation26]  }
  0xa7   :  { %s199_s26 = sshll.u32 %s4052_s29, 4  ;;  %s221_s6 = sshll.u32 %s4053_s5, 4  ;;  %s200_s26 = int_to_ptr.vmem [resolvable:$true] %s199_s26  ;;  %s4331_s6 = int_to_ptr.vmem [resolvable:$true] %s221_s6 }
  0xa8   :  { %s3528_s10 = scalar_lea.hbm %s4897_s13, 512 }
  0xa9   :  { %p3529_p6 = scmp.ne.s32.totalorder %s4897_s13, %s3528_s10  ;;  %p3532_p7 = scmp.lt.u32.totalorder %s3528_s10, %s4897_s13 }
  0xab   :  { %p3534_p8 = pnand %p3532_p7, %p3529_p6 }
  0xad   :  { %3537 = shalt.err (!%p3534_p8)
}
  0xae   :  { %s3538_s3 = scalar_lea.vmem %s200_s26, 512  ;;  %p3543_p10 = scmp.lt.s32.totalorder %s200_s26, %s200_s26 }
  0xaf   :  { %p3539_p9 = scmp.ne.s32.totalorder %s200_s26, %s3538_s3  ;;  %p3544_p11 = scmp.lt.s32.totalorder %s3538_s3, %s3538_s3 }
  0xb1   :  { %p3545_p12 = por %p3544_p11, %p3543_p10 }
  0xb3   :  { %p3546_p13 = pnand %p3545_p12, %p3539_p9 }
  0xb5   :  { %3549 = shalt.err (!%p3546_p13)
}
  0xb6   :  { %205 = dma.hbm_to_vmem [thread:$0]  %s4897_s13, 512, %s200_s26, [#allocation24], %s4952_s7, %s4952_s7, %s4951_s0  }
  0xb7   :  { %s3550_s29 = scalar_lea.hbm %s4899_s15, 512 }
  0xb8   :  { %p3551_p0 = scmp.ne.s32.totalorder %s4899_s15, %s3550_s29  ;;  %p3554_p1 = scmp.lt.u32.totalorder %s3550_s29, %s4899_s15 }
  0xba   :  { %p3556_p2 = pnand %p3554_p1, %p3551_p0 }
  0xbc   :  { %3559 = shalt.err (!%p3556_p2)
}
  0xbd   :  { %s3560_s4 = scalar_lea.vmem %s4331_s6, 512  ;;  %p3565_p4 = scmp.lt.s32.totalorder %s4331_s6, %s4331_s6 }
  0xbe   :  { %p3561_p3 = scmp.ne.s32.totalorder %s4331_s6, %s3560_s4  ;;  %p3566_p5 = scmp.lt.s32.totalorder %s3560_s4, %s3560_s4 }
  0xc0   :  { %p3567_p6 = por %p3566_p5, %p3565_p4 }
  0xc2   :  { %p3568_p7 = pnand %p3567_p6, %p3561_p3 }
  0xc4   :  { %3571 = shalt.err (!%p3568_p7)
}
  0xc5   :  { %227 = dma.hbm_to_vmem [thread:$0]  %s4899_s15, 512, %s4331_s6, [#allocation27], %s4952_s7, %s4952_s7, %s4951_s0  }
  0xc6   :  { %s4054_s28 = smov [#allocation29]   ;;  %s4055_s11 = smov [#allocation32]  }
  0xc7   :  { %s244_s1 = sshll.u32 %s4054_s28, 4  ;;  %s263_s3 = sshll.u32 %s4055_s11, 4  ;;  %s245_s1 = int_to_ptr.vmem [resolvable:$true] %s244_s1  ;;  %s4368_s3 = int_to_ptr.vmem [resolvable:$true] %s263_s3 }
  0xc8   :  { %s3572_s9 = scalar_lea.hbm %s4901_s17, 16 }
  0xc9   :  { %p3573_p8 = scmp.ne.s32.totalorder %s4901_s17, %s3572_s9  ;;  %p3576_p9 = scmp.lt.u32.totalorder %s3572_s9, %s4901_s17 }
  0xcb   :  { %p3578_p10 = pnand %p3576_p9, %p3573_p8 }
  0xcd   :  { %3581 = shalt.err (!%p3578_p10)
}
  0xce   :  { %s3582_s15 = scalar_lea.vmem %s245_s1, 16  ;;  %s3586_s6 = scalar_lea.vmem %s245_s1, 32 }
  0xcf   :  { %p3583_p11 = scmp.ne.s32.totalorder %s245_s1, %s3582_s15  ;;  %p3587_p12 = scmp.lt.s32.totalorder %s245_s1, %s245_s1 }
  0xd0   :  { %p3588_p13 = scmp.lt.s32.totalorder %s3586_s6, %s3582_s15 }
  0xd2   :  { %p3589_p0 = por %p3588_p13, %p3587_p12 }
  0xd4   :  { %p3590_p1 = pnand %p3589_p0, %p3583_p11 }
  0xd6   :  { %3593 = shalt.err (!%p3590_p1)
}
  0xd7   :  { %247 = dma.hbm_to_vmem [thread:$0]  %s4901_s17, 16, %s245_s1, [#allocation30]  }
  0xd8   :  { %s3594_s26 = scalar_lea.hbm %s4903_s19, 512 }
  0xd9   :  { %p3595_p2 = scmp.ne.s32.totalorder %s4903_s19, %s3594_s26  ;;  %p3598_p3 = scmp.lt.u32.totalorder %s3594_s26, %s4903_s19 }
  0xdb   :  { %p3600_p4 = pnand %p3598_p3, %p3595_p2 }
  0xdd   :  { %3603 = shalt.err (!%p3600_p4)
}
  0xde   :  { %s3604_s9 = scalar_lea.vmem %s4368_s3, 512  ;;  %p3609_p6 = scmp.lt.s32.totalorder %s4368_s3, %s4368_s3 }
  0xdf   :  { %p3605_p5 = scmp.ne.s32.totalorder %s4368_s3, %s3604_s9  ;;  %p3610_p7 = scmp.lt.s32.totalorder %s3604_s9, %s3604_s9 }
  0xe1   :  { %p3611_p8 = por %p3610_p7, %p3609_p6 }
  0xe3   :  { %p3612_p9 = pnand %p3611_p8, %p3605_p5 }
  0xe5   :  { %3615 = shalt.err (!%p3612_p9)
}
  0xe6   :  { %269 = dma.hbm_to_vmem [thread:$0]  %s4903_s19, 512, %s4368_s3, [#allocation33], %s4952_s7, %s4952_s7, %s4951_s0  }
  0xe7   :  { %s4056_s25 = smov [#allocation35]   ;;  %s4057_s5 = smov [#allocation38]  }
  0xe8   :  { %s285_s29 = sshll.u32 %s4056_s25, 4  ;;  %s308_s8 = sshll.u32 %s4057_s5, 4  ;;  %s286_s29 = int_to_ptr.vmem [resolvable:$true] %s285_s29  ;;  %s309_s8 = int_to_ptr.vmem [resolvable:$true] %s308_s8 }
  0xe9   :  { %s3616_s2 = scalar_lea.hbm %s4905_s21, 1024 }
  0xea   :  { %p3617_p10 = scmp.ne.s32.totalorder %s4905_s21, %s3616_s2  ;;  %p3620_p11 = scmp.lt.u32.totalorder %s3616_s2, %s4905_s21 }
  0xec   :  { %p3622_p12 = pnand %p3620_p11, %p3617_p10 }
  0xee   :  { %3625 = shalt.err (!%p3622_p12)
}
  0xef   :  { %s3626_s19 = scalar_lea.vmem %s286_s29, 1024  ;;  %p3631_p0 = scmp.lt.s32.totalorder %s286_s29, %s286_s29 }
  0xf0   :  { %p3627_p13 = scmp.ne.s32.totalorder %s286_s29, %s3626_s19  ;;  %p3632_p1 = scmp.lt.s32.totalorder %s3626_s19, %s3626_s19 }
  0xf2   :  { %p3633_p2 = por %p3632_p1, %p3631_p0 }
  0xf4   :  { %p3634_p3 = pnand %p3633_p2, %p3627_p13 }
  0xf6   :  { %3637 = shalt.err (!%p3634_p3)
}
  0xf7   :  { %291 = dma.hbm_to_vmem [thread:$0]  %s4905_s21, 1024, %s286_s29, [#allocation36], %s4952_s7, %s4952_s7, %s4951_s0  }
  0xf8   :  { %s3638_s30 = scalar_lea.hbm %s4907_s23, 16 }
  0xf9   :  { %p3639_p4 = scmp.ne.s32.totalorder %s4907_s23, %s3638_s30  ;;  %p3642_p5 = scmp.lt.u32.totalorder %s3638_s30, %s4907_s23 }
  0xfb   :  { %p3644_p6 = pnand %p3642_p5, %p3639_p4 }
  0xfd   :  { %3647 = shalt.err (!%p3644_p6)
}
  0xfe   :  { %s3648_s5 = scalar_lea.vmem %s309_s8, 16  ;;  %s3652_s15 = scalar_lea.vmem %s309_s8, 32 }
  0xff   :  { %p3649_p7 = scmp.ne.s32.totalorder %s309_s8, %s3648_s5  ;;  %p3653_p8 = scmp.lt.s32.totalorder %s309_s8, %s309_s8 }
 0x100   :  { %p3654_p9 = scmp.lt.s32.totalorder %s3652_s15, %s3648_s5 }
 0x102   :  { %p3655_p10 = por %p3654_p9, %p3653_p8 }
 0x104   :  { %p3656_p11 = pnand %p3655_p10, %p3649_p7 }
 0x106   :  { %3659 = shalt.err (!%p3656_p11)
}
 0x107   :  { %311 = dma.hbm_to_vmem [thread:$0]  %s4907_s23, 16, %s309_s8, [#allocation39]  }
 0x108   :  { %s4058_s6 = smov [#allocation2]   ;;  %s4059_s10 = smov [#allocation7]  }
 0x109   :  { %s53_s2 = sshll.u32 %s4058_s6, 4  ;;  %s77_s4 = sshll.u32 %s4059_s10, 4  ;;  %s54_s2 = int_to_ptr.vmem [resolvable:$true] %s53_s2  ;;  %s4429_s4 = int_to_ptr.vmem [resolvable:$true] %s77_s4 }
 0x10a   :  { %s4956_s19 = sld [smem:[#allocation60_spill]] }
 0x110   :  { %s3660_s3 = scalar_lea.hbm %s4956_s19, 256 }
 0x111   :  { %p3661_p12 = scmp.ne.s32.totalorder %s4956_s19, %s3660_s3  ;;  %p3664_p13 = scmp.lt.u32.totalorder %s3660_s3, %s4956_s19 }
 0x113   :  { %p3666_p0 = pnand %p3664_p13, %p3661_p12 }
 0x115   :  { %3669 = shalt.err (!%p3666_p0)
}
 0x116   :  { %s3670_s23 = scalar_lea.vmem %s54_s2, 256  ;;  %p3675_p2 = scmp.lt.s32.totalorder %s54_s2, %s54_s2 }
 0x117   :  { %p3671_p1 = scmp.ne.s32.totalorder %s54_s2, %s3670_s23  ;;  %p3676_p3 = scmp.lt.s32.totalorder %s3670_s23, %s3670_s23 }
 0x119   :  { %p3677_p4 = por %p3676_p3, %p3675_p2 }
 0x11b   :  { %p3678_p5 = pnand %p3677_p4, %p3671_p1 }
 0x11d   :  { %3681 = shalt.err (!%p3678_p5)
}
 0x11e   :  { %59 = dma.hbm_to_vmem [thread:$0]  %s4956_s19, 256, %s54_s2, [#allocation3], %s4952_s7, %s4952_s7, %s4951_s0  }
 0x11f   :  { %s4957_s25 = sld [smem:[#allocation62_spill]] }
 0x125   :  { %s3682_s5 = scalar_lea.hbm %s4957_s25, 256 }
 0x126   :  { %p3683_p6 = scmp.ne.s32.totalorder %s4957_s25, %s3682_s5  ;;  %p3686_p7 = scmp.lt.u32.totalorder %s3682_s5, %s4957_s25 }
 0x128   :  { %p3688_p8 = pnand %p3686_p7, %p3683_p6 }
 0x12a   :  { %3691 = shalt.err (!%p3688_p8)
}
 0x12b   :  { %s3692_s10 = scalar_lea.vmem %s4429_s4, 256  ;;  %p3697_p10 = scmp.lt.s32.totalorder %s4429_s4, %s4429_s4 }
 0x12c   :  { %p3693_p9 = scmp.ne.s32.totalorder %s4429_s4, %s3692_s10  ;;  %p3698_p11 = scmp.lt.s32.totalorder %s3692_s10, %s3692_s10 }
 0x12e   :  { %p3699_p12 = por %p3698_p11, %p3697_p10 }
 0x130   :  { %p3700_p13 = pnand %p3699_p12, %p3693_p9 }
 0x132   :  { %3703 = shalt.err (!%p3700_p13)
}
 0x133   :  { %83 = dma.hbm_to_vmem [thread:$0]  %s4957_s25, 256, %s4429_s4, [#allocation6], %s4952_s7, %s4952_s7, %s4951_s0  }
 0x134   :  { %s4060_s26 = smov [#allocation10]   ;;  %s4061_s3 = smov [#allocation13]  }
 0x135   :  { %s101_s19 = sshll.u32 %s4060_s26, 4  ;;  %s126_s28 = sshll.u32 %s4061_s3, 4  ;;  %s102_s19 = int_to_ptr.vmem [resolvable:$true] %s101_s19  ;;  %s127_s28 = int_to_ptr.vmem [resolvable:$true] %s126_s28 }
 0x136   :  { %s4958_s30 = sld [smem:[#allocation64_spill]] }
 0x13c   :  { %s3704_s23 = scalar_lea.hbm %s4958_s30, 64 }
 0x13d   :  { %p3705_p0 = scmp.ne.s32.totalorder %s4958_s30, %s3704_s23  ;;  %p3708_p1 = scmp.lt.u32.totalorder %s3704_s23, %s4958_s30 }
 0x13f   :  { %p3710_p2 = pnand %p3708_p1, %p3705_p0 }
 0x141   :  { %3713 = shalt.err (!%p3710_p2)
}
 0x142   :  { %s3714_s4 = scalar_lea.vmem %s102_s19, 64  ;;  %p3719_p4 = scmp.lt.s32.totalorder %s102_s19, %s102_s19 }
 0x143   :  { %p3715_p3 = scmp.ne.s32.totalorder %s102_s19, %s3714_s4  ;;  %p3720_p5 = scmp.lt.s32.totalorder %s3714_s4, %s3714_s4 }
 0x145   :  { %p3721_p6 = por %p3720_p5, %p3719_p4 }
 0x147   :  { %p3722_p7 = pnand %p3721_p6, %p3715_p3 }
 0x149   :  { %3725 = shalt.err (!%p3722_p7)
}
 0x14a   :  { %s4959_s25 = smov 2   ;;  %s4960_s5 = smov 32  }
 0x14b   :  { %107 = dma.hbm_to_vmem [thread:$0]  %s4958_s30, 64, %s102_s19, [#allocation9], %s4960_s5, %s4960_s5, %s4959_s25  }
 0x14c   :  { %s4961_s10 = sld [smem:[#allocation66_spill]] }
 0x152   :  { %s3726_s2 = scalar_lea.hbm %s4961_s10, 16 }
 0x153   :  { %p3727_p8 = scmp.ne.s32.totalorder %s4961_s10, %s3726_s2  ;;  %p3730_p9 = scmp.lt.u32.totalorder %s3726_s2, %s4961_s10 }
 0x155   :  { %p3732_p10 = pnand %p3730_p9, %p3727_p8 }
 0x157   :  { %3735 = shalt.err (!%p3732_p10)
}
 0x158   :  { %s3736_s27 = scalar_lea.vmem %s127_s28, 16  ;;  %s3740_s23 = scalar_lea.vmem %s127_s28, 32 }
 0x159   :  { %p3737_p11 = scmp.ne.s32.totalorder %s127_s28, %s3736_s27  ;;  %p3741_p12 = scmp.lt.s32.totalorder %s127_s28, %s127_s28 }
 0x15a   :  { %p3742_p13 = scmp.lt.s32.totalorder %s3740_s23, %s3736_s27 }
 0x15c   :  { %p3743_p0 = por %p3742_p13, %p3741_p12 }
 0x15e   :  { %p3744_p1 = pnand %p3743_p0, %p3737_p11 }
 0x160   :  { %3747 = shalt.err (!%p3744_p1)
}
 0x161   :  { %129 = dma.hbm_to_vmem [thread:$0]  %s4961_s10, 16, %s127_s28, [#allocation12]  }
 0x162   :  { %s4062_s8 = smov [#allocation16]   ;;  %s4063_s17 = smov [#allocation19]  }
 0x163   :  { %s148_s9 = sshll.u32 %s4062_s8, 4  ;;  %s168_s1 = sshll.u32 %s4063_s17, 4  ;;  %s149_s9 = int_to_ptr.vmem [resolvable:$true] %s148_s9  ;;  %s169_s1 = int_to_ptr.vmem [resolvable:$true] %s168_s1 }
 0x164   :  { %s4962_s5 = sld [smem:[#allocation68_spill]] }
 0x16a   :  { %s3748_s15 = scalar_lea.hbm %s4962_s5, 16 }
 0x16b   :  { %p3749_p2 = scmp.ne.s32.totalorder %s4962_s5, %s3748_s15  ;;  %p3752_p3 = scmp.lt.u32.totalorder %s3748_s15, %s4962_s5 }
 0x16d   :  { %p3754_p4 = pnand %p3752_p3, %p3749_p2 }
 0x16f   :  { %3757 = shalt.err (!%p3754_p4)
}
 0x170   :  { %s3758_s28 = scalar_lea.vmem %s149_s9, 16  ;;  %s3762_s10 = scalar_lea.vmem %s149_s9, 32 }
 0x171   :  { %p3759_p5 = scmp.ne.s32.totalorder %s149_s9, %s3758_s28  ;;  %p3763_p6 = scmp.lt.s32.totalorder %s149_s9, %s149_s9 }
 0x172   :  { %p3764_p7 = scmp.lt.s32.totalorder %s3762_s10, %s3758_s28 }
 0x174   :  { %p3765_p8 = por %p3764_p7, %p3763_p6 }
 0x176   :  { %p3766_p9 = pnand %p3765_p8, %p3759_p5 }
 0x178   :  { %3769 = shalt.err (!%p3766_p9)
}
 0x179   :  { %151 = dma.hbm_to_vmem [thread:$0]  %s4962_s5, 16, %s149_s9, [#allocation15]  }
 0x17a   :  { %s4963_s27 = sld [smem:[#allocation70_spill]] }
 0x180   :  { %s3770_s23 = scalar_lea.hbm %s4963_s27, 16 }
 0x181   :  { %p3771_p10 = scmp.ne.s32.totalorder %s4963_s27, %s3770_s23  ;;  %p3774_p11 = scmp.lt.u32.totalorder %s3770_s23, %s4963_s27 }
 0x183   :  { %p3776_p12 = pnand %p3774_p11, %p3771_p10 }
 0x185   :  { %3779 = shalt.err (!%p3776_p12)
}
 0x186   :  { %s3780_s4 = scalar_lea.vmem %s169_s1, 16  ;;  %s3784_s25 = scalar_lea.vmem %s169_s1, 32 }
 0x187   :  { %p3781_p13 = scmp.ne.s32.totalorder %s169_s1, %s3780_s4  ;;  %p3785_p0 = scmp.lt.s32.totalorder %s169_s1, %s169_s1 }
 0x188   :  { %p3786_p1 = scmp.lt.s32.totalorder %s3784_s25, %s3780_s4 }
 0x18a   :  { %p3787_p2 = por %p3786_p1, %p3785_p0 }
 0x18c   :  { %p3788_p3 = pnand %p3787_p2, %p3781_p13 }
 0x18e   :  { %3791 = shalt.err (!%p3788_p3)
}
 0x18f   :  { %171 = dma.hbm_to_vmem [thread:$0]  %s4963_s27, 16, %s169_s1, [#allocation18]  }
 0x190   :  { %s4064_s15 = smov [#allocation22]   ;;  %s4065_s29 = smov [#allocation25]  }
 0x191   :  { %s190_s21 = sshll.u32 %s4064_s15, 4  ;;  %s212_s6 = sshll.u32 %s4065_s29, 4  ;;  %s191_s21 = int_to_ptr.vmem [resolvable:$true] %s190_s21  ;;  %s213_s6 = int_to_ptr.vmem [resolvable:$true] %s212_s6 }
 0x192   :  { %s3792_s10 = scalar_lea.hbm %s4896_s12, 16 }
 0x193   :  { %p3793_p4 = scmp.ne.s32.totalorder %s4896_s12, %s3792_s10  ;;  %p3796_p5 = scmp.lt.u32.totalorder %s3792_s10, %s4896_s12 }
 0x195   :  { %p3798_p6 = pnand %p3796_p5, %p3793_p4 }
 0x197   :  { %3801 = shalt.err (!%p3798_p6)
}
 0x198   :  { %s3802_s1 = scalar_lea.vmem %s191_s21, 16  ;;  %s3806_s27 = scalar_lea.vmem %s191_s21, 32 }
 0x199   :  { %p3803_p7 = scmp.ne.s32.totalorder %s191_s21, %s3802_s1  ;;  %p3807_p8 = scmp.lt.s32.totalorder %s191_s21, %s191_s21 }
 0x19a   :  { %p3808_p9 = scmp.lt.s32.totalorder %s3806_s27, %s3802_s1 }
 0x19c   :  { %p3809_p10 = por %p3808_p9, %p3807_p8 }
 0x19e   :  { %p3810_p11 = pnand %p3809_p10, %p3803_p7 }
 0x1a0   :  { %3813 = shalt.err (!%p3810_p11)
}
 0x1a1   :  { %193 = dma.hbm_to_vmem [thread:$0]  %s4896_s12, 16, %s191_s21, [#allocation21]  }
 0x1a2   :  { %s3814_s17 = scalar_lea.hbm %s4898_s14, 16 }
 0x1a3   :  { %p3815_p12 = scmp.ne.s32.totalorder %s4898_s14, %s3814_s17  ;;  %p3818_p13 = scmp.lt.u32.totalorder %s3814_s17, %s4898_s14 }
 0x1a5   :  { %p3820_p0 = pnand %p3818_p13, %p3815_p12 }
 0x1a7   :  { %3823 = shalt.err (!%p3820_p0)
}
 0x1a8   :  { %s3824_s15 = scalar_lea.vmem %s213_s6, 16  ;;  %s3828_s29 = scalar_lea.vmem %s213_s6, 32 }
 0x1a9   :  { %p3825_p1 = scmp.ne.s32.totalorder %s213_s6, %s3824_s15  ;;  %p3829_p2 = scmp.lt.s32.totalorder %s213_s6, %s213_s6 }
 0x1aa   :  { %p3830_p3 = scmp.lt.s32.totalorder %s3828_s29, %s3824_s15 }
 0x1ac   :  { %p3831_p4 = por %p3830_p3, %p3829_p2 }
 0x1ae   :  { %p3832_p5 = pnand %p3831_p4, %p3825_p1 }
 0x1b0   :  { %3835 = shalt.err (!%p3832_p5)
}
 0x1b1   :  { %215 = dma.hbm_to_vmem [thread:$0]  %s4898_s14, 16, %s213_s6, [#allocation24]  }
 0x1b2   :  { %s4066_s2 = smov [#allocation28]   ;;  %s4067_s10 = smov [#allocation31]  }
 0x1b3   :  { %s234_s28 = sshll.u32 %s4066_s2, 4  ;;  %s254_s13 = sshll.u32 %s4067_s10, 4  ;;  %s235_s28 = int_to_ptr.vmem [resolvable:$true] %s234_s28  ;;  %s255_s13 = int_to_ptr.vmem [resolvable:$true] %s254_s13 }
 0x1b4   :  { %s3836_s11 = scalar_lea.hbm %s4900_s16, 16 }
 0x1b5   :  { %p3837_p6 = scmp.ne.s32.totalorder %s4900_s16, %s3836_s11  ;;  %p3840_p7 = scmp.lt.u32.totalorder %s3836_s11, %s4900_s16 }
 0x1b7   :  { %p3842_p8 = pnand %p3840_p7, %p3837_p6 }
 0x1b9   :  { %3845 = shalt.err (!%p3842_p8)
}
 0x1ba   :  { %s3846_s14 = scalar_lea.vmem %s235_s28, 16  ;;  %s3850_s6 = scalar_lea.vmem %s235_s28, 32 }
 0x1bb   :  { %p3847_p9 = scmp.ne.s32.totalorder %s235_s28, %s3846_s14  ;;  %p3851_p10 = scmp.lt.s32.totalorder %s235_s28, %s235_s28 }
 0x1bc   :  { %p3852_p11 = scmp.lt.s32.totalorder %s3850_s6, %s3846_s14 }
 0x1be   :  { %p3853_p12 = por %p3852_p11, %p3851_p10 }
 0x1c0   :  { %p3854_p13 = pnand %p3853_p12, %p3847_p9 }
 0x1c2   :  { %3857 = shalt.err (!%p3854_p13)
}
 0x1c3   :  { %237 = dma.hbm_to_vmem [thread:$0]  %s4900_s16, 16, %s235_s28, [#allocation27]  }
 0x1c4   :  { %s3858_s25 = scalar_lea.hbm %s4902_s18, 16 }
 0x1c5   :  { %p3859_p0 = scmp.ne.s32.totalorder %s4902_s18, %s3858_s25  ;;  %p3862_p1 = scmp.lt.u32.totalorder %s3858_s25, %s4902_s18 }
 0x1c7   :  { %p3864_p2 = pnand %p3862_p1, %p3859_p0 }
 0x1c9   :  { %3867 = shalt.err (!%p3864_p2)
}
 0x1ca   :  { %s3868_s12 = scalar_lea.vmem %s255_s13, 16  ;;  %s3872_s21 = scalar_lea.vmem %s255_s13, 32 }
 0x1cb   :  { %p3869_p3 = scmp.ne.s32.totalorder %s255_s13, %s3868_s12  ;;  %p3873_p4 = scmp.lt.s32.totalorder %s255_s13, %s255_s13 }
 0x1cc   :  { %p3874_p5 = scmp.lt.s32.totalorder %s3872_s21, %s3868_s12 }
 0x1ce   :  { %p3875_p6 = por %p3874_p5, %p3873_p4 }
 0x1d0   :  { %p3876_p7 = pnand %p3875_p6, %p3869_p3 }
 0x1d2   :  { %3879 = shalt.err (!%p3876_p7)
}
 0x1d3   :  { %257 = dma.hbm_to_vmem [thread:$0]  %s4902_s18, 16, %s255_s13, [#allocation30]  }
 0x1d4   :  { %s4068_s28 = smov [#allocation34]   ;;  %s4069_s26 = smov [#allocation37]  }
 0x1d5   :  { %s276_s10 = sshll.u32 %s4068_s28, 4  ;;  %s298_s3 = sshll.u32 %s4069_s26, 4  ;;  %s277_s10 = int_to_ptr.vmem [resolvable:$true] %s276_s10  ;;  %s299_s3 = int_to_ptr.vmem [resolvable:$true] %s298_s3 }
 0x1d6   :  { %s3880_s27 = scalar_lea.hbm %s4904_s20, 16 }
 0x1d7   :  { %p3881_p8 = scmp.ne.s32.totalorder %s4904_s20, %s3880_s27  ;;  %p3884_p9 = scmp.lt.u32.totalorder %s3880_s27, %s4904_s20 }
 0x1d9   :  { %p3886_p10 = pnand %p3884_p9, %p3881_p8 }
 0x1db   :  { %3889 = shalt.err (!%p3886_p10)
}
 0x1dc   :  { %s3890_s18 = scalar_lea.vmem %s277_s10, 16  ;;  %s3894_s13 = scalar_lea.vmem %s277_s10, 32 }
 0x1dd   :  { %p3891_p11 = scmp.ne.s32.totalorder %s277_s10, %s3890_s18  ;;  %p3895_p12 = scmp.lt.s32.totalorder %s277_s10, %s277_s10 }
 0x1de   :  { %p3896_p13 = scmp.lt.s32.totalorder %s3894_s13, %s3890_s18 }
 0x1e0   :  { %p3897_p0 = por %p3896_p13, %p3895_p12 }
 0x1e2   :  { %p3898_p1 = pnand %p3897_p0, %p3891_p11 }
 0x1e4   :  { %3901 = shalt.err (!%p3898_p1)
}
 0x1e5   :  { %279 = dma.hbm_to_vmem [thread:$0]  %s4904_s20, 16, %s277_s10, [#allocation33]  }
 0x1e6   :  { %s3902_s25 = scalar_lea.hbm %s4906_s22, 16 }
 0x1e7   :  { %p3903_p2 = scmp.ne.s32.totalorder %s4906_s22, %s3902_s25  ;;  %p3906_p3 = scmp.lt.u32.totalorder %s3902_s25, %s4906_s22 }
 0x1e9   :  { %p3908_p4 = pnand %p3906_p3, %p3903_p2 }
 0x1eb   :  { %3911 = shalt.err (!%p3908_p4)
}
 0x1ec   :  { %s3912_s12 = scalar_lea.vmem %s299_s3, 16  ;;  %s3916_s21 = scalar_lea.vmem %s299_s3, 32 }
 0x1ed   :  { %p3913_p5 = scmp.ne.s32.totalorder %s299_s3, %s3912_s12  ;;  %p3917_p6 = scmp.lt.s32.totalorder %s299_s3, %s299_s3 }
 0x1ee   :  { %p3918_p7 = scmp.lt.s32.totalorder %s3916_s21, %s3912_s12 }
 0x1f0   :  { %p3919_p8 = por %p3918_p7, %p3917_p6 }
 0x1f2   :  { %p3920_p9 = pnand %p3919_p8, %p3913_p5 }
 0x1f4   :  { %3923 = shalt.err (!%p3920_p9)
}
 0x1f5   :  { %301 = dma.hbm_to_vmem [thread:$0]  %s4906_s22, 16, %s299_s3, [#allocation36]  }
 0x1f6   :  { %s4070_s2 = smov [#allocation40]   ;;  %s3924_s11 = scalar_lea.hbm %s4908_s24, 16 }
 0x1f7   :  { %s318_s28 = sshll.u32 %s4070_s2, 4  ;;  %p3925_p10 = scmp.ne.s32.totalorder %s4908_s24, %s3924_s11  ;;  %s319_s28 = int_to_ptr.vmem [resolvable:$true] %s318_s28 }
 0x1f8   :  { %p3928_p11 = scmp.lt.u32.totalorder %s3924_s11, %s4908_s24 }
 0x1fa   :  { %p3930_p12 = pnand %p3928_p11, %p3925_p10 }
 0x1fc   :  { %3933 = shalt.err (!%p3930_p12)
}
 0x1fd   :  { %s3934_s14 = scalar_lea.vmem %s319_s28, 16  ;;  %s3938_s22 = scalar_lea.vmem %s319_s28, 32 }
 0x1fe   :  { %p3935_p13 = scmp.ne.s32.totalorder %s319_s28, %s3934_s14  ;;  %p3939_p0 = scmp.lt.s32.totalorder %s319_s28, %s319_s28 }
 0x1ff   :  { %p3940_p1 = scmp.lt.s32.totalorder %s3938_s22, %s3934_s14 }
 0x201   :  { %p3941_p2 = por %p3940_p1, %p3939_p0 }
 0x203   :  { %p3942_p3 = pnand %p3941_p2, %p3935_p13 }
 0x205   :  { %3945 = shalt.err (!%p3942_p3)
}
 0x206   :  { %321 = dma.hbm_to_vmem [thread:$0]  %s4908_s24, 16, %s319_s28, [#allocation39]  }
 0x207   :  { %4012 = dma.done.wait [#allocation3], 256  }
 0x208   :  { %4013 = vsyncadd [#allocation3], 4294967040 }
 0x209   :  { %4014 = dma.done.wait [#allocation6], 768  }
 0x20a   :  { %4015 = vsyncadd [#allocation6], 4294966528 }
 0x20b   :  { %4016 = dma.done.wait [#allocation9], 128  }
 0x20c   :  { %4017 = vsyncadd [#allocation9], 4294967168 }
 0x20d   :  { %4018 = dma.done.wait [#allocation12], 528  }
 0x20e   :  { %4019 = vsyncadd [#allocation12], 4294966768 }
 0x20f   :  { %4020 = dma.done.wait [#allocation15], 528  }
 0x210   :  { %4021 = vsyncadd [#allocation15], 4294966768 }
 0x211   :  { %4022 = dma.done.wait [#allocation18], 32  }
 0x212   :  { %4023 = vsyncadd [#allocation18], 4294967264 }
 0x213   :  { %4024 = dma.done.wait [#allocation21], 528  }
 0x214   :  { %4025 = vsyncadd [#allocation21], 4294966768 }
 0x215   :  { %4026 = dma.done.wait [#allocation24], 528  }
 0x216   :  { %4027 = vsyncadd [#allocation24], 4294966768 }
 0x217   :  { %4028 = dma.done.wait [#allocation27], 528  }
 0x218   :  { %4029 = vsyncadd [#allocation27], 4294966768 }
 0x219   :  { %4030 = dma.done.wait [#allocation30], 32  }
 0x21a   :  { %4031 = vsyncadd [#allocation30], 4294967264 }
 0x21b   :  { %4032 = dma.done.wait [#allocation33], 528  }
 0x21c   :  { %4033 = vsyncadd [#allocation33], 4294966768 }
 0x21d   :  { %4034 = dma.done.wait [#allocation36], 1040  }
 0x21e   :  { %4035 = vsyncadd [#allocation36], 4294966256 }
 0x21f   :  { %4036 = dma.done.wait [#allocation39], 32  }
 0x220   :  { %4037 = vsyncadd [#allocation39], 4294967264  ;;  %vm432_vm0 = vcmask 261120   ;;  %v421_v0 = vld [vmem:[#allocation11] sm:$0xff]  ;;  %v422_v1 = vld [vmem:[#allocation11 + $0x8] sm:$0xff]  ;;  %v4071_v8 = vmov 0.0  }
 0x221   :  { %v423_v2 = vld [vmem:[#allocation11 + $0x10] sm:$0xff]  ;;  %v3183_v3 = vpack.c.bf16 %v422_v1, %v421_v0  ;;  %v424_v4 = vld [vmem:[#allocation11 + $0x18] sm:$0xff]  ;;  %v4605_v7 = vld [vmem:[#allocation2 + $0x8] sm:$0xff]  ;;  %3014 = vmatprep.subr.mxu0 %v4071_v8  ;;  %vm4072_vm1 = vmmov 0   ;;  %s4073_s24 = smov 96   ;;  %vm524_vm2 = vcmask 130048  }
 0x222   :  { %v4601_v5 = vld [vmem:[#allocation2] sm:$0xff]  ;;  %v3187_v6 = vpack.c.bf16 %v424_v4, %v423_v2  ;;  %3016 = vmatprep.mubr.msk.f32.mxu0 %vm4072_vm1, %v4071_v8  ;;  %v2832_v9 = vld [vmem:[#allocation13] ss:$0 sm:$0xff]  ;;  %vm678_vm4 = vcmask 64512   ;;  %s4074_s18 = smov 64   ;;  %s4075_s13 = smov 80   ;;  %vm4732_vm6 = vmpackc.low %vm524_vm2, %vm524_vm2 }
 0x223   :  { %3001 = vmatprep.mubr.msk.f32.mxu1 %vm432_vm0, %v4601_v5  ;;  %3184 = vmatprep.subr.bf16.mxu1 %v3183_v3  ;;  %v2894_v16 = vld [vmem:[#allocation8] sm:$0xf]   ;;  %s4076_s30 = smov 112   ;;  %s4077_s8 = smov 48   ;;  %vm2640_vm9 = vcmask 523264  }
 0x224   :  { %3186 = vmatpush3.bf16.msra.mxu1 %v3183_v3  ;;  %v2895_v17 = vunpack.c.0.s8 %v2894_v16  ;;  %v2896_v19 = vunpack.c.1.s8 %v2894_v16  ;;  %s4080_s17 = smov [#allocation42]  }
 0x225   :  { %3188 = vmatprep.subr.bf16.mxu1 %v3187_v6  ;;  %s2789_s4 = sshll.u32 %s4080_s17, 4  ;;  %s2790_s4 = int_to_ptr.vmem [resolvable:$true] %s2789_s4 }
 0x226   :  { %v4635_v18 = vcvt.s32.f32 %v2895_v17  ;;  %v4638_v20 = vcvt.s32.f32 %v2896_v19  ;;  %s3946_s25 = scalar_lea.vmem %s2790_s4, 512  ;;  %p3951_p5 = scmp.lt.s32.totalorder %s2790_s4, %s2790_s4 }
 0x227   :  { %p3947_p4 = scmp.ne.s32.totalorder %s2790_s4, %s3946_s25  ;;  %p3952_p6 = scmp.lt.s32.totalorder %s3946_s25, %s3946_s25 }
 0x228   :  { %3190 = vmatpush3.bf16.msra.mxu1 %v3187_v6  ;;  %vm411_vm3 = vcmp.gt.f32.partialorder %v4635_v18, 0.0  ;;  %vm412_vm5 = vcmp.gt.f32.partialorder %v4638_v20, 0.0 }
 0x229   :  { %3004 = vmatprep.subr.mxu1 %v4071_v8  ;;  %p3953_p7 = por %p3952_p6, %p3951_p5 }
 0x22b   :  { %3002 = vmatmul.mubr.msk.f32.vlgmr.msra.gmra.mrb[0].mxu1 %vm432_vm0, %v4605_v7  ;;  %p3954_p8 = pnand %p3953_p7, %p3947_p4 }
 0x22c   :  { %3006 = vmatprep.mubr.msk.f32.mxu1 %vm4072_vm1, %v4071_v8 }
 0x2fe   :  { %v3003_v10 = vpop.f32.mrb[0].mxu1 }
 0x2ff   :  { %v505_v11 = vpop.f32.mrb[1].mxu1  ;;  %v4619_v13 = vadd.f32 %v3003_v10, %v2832_v9 }
 0x300   :  { %v4615_v12 = vadd.f32 %v2832_v9, %v505_v11 }
 0x302   :  { %522 = vrot.lane.b32.xlu0 %v4615_v12, %s4073_s24 }
 0x306   :  { %600 = vrot.lane.b32.xlu0 %v4619_v13, %s4073_s24 }
 0x374   :  { %v523_v14 = vpop.permute.xlu0 %522 }
 0x375   :  { %3005 = vmatpush3.xpose.msk.msra.mxu1 %vm524_vm2, %v523_v14 }
 0x376   :  { %3009 = vmatprep.subr.mxu1 %v4071_v8 }
 0x378   :  { %3007 = vmatmul.mubr.msk.f32.vlgmr.msra.gmra.mrb[2].mxu1 %vm524_vm2, %v4615_v12  ;;  %v601_v15 = vpop.permute.xlu0 %600 }
 0x379   :  { %3010 = vmatpush3.xpose.msk.msra.mxu1 %vm524_vm2, %v601_v15  ;;  %3011 = vmatprep.mubr.msk.f32.mxu1 %vm4072_vm1, %v4071_v8 }
 0x37a   :  { %3019 = vmatprep.subr.mxu1 %v4071_v8 }
 0x37c   :  { %3012 = vmatmul.mubr.msk.f32.vlgmr.msra.gmra.mrb[4].mxu1 %vm524_vm2, %v4619_v13 }
 0x37d   :  { %3021 = vmatprep.mubr.msk.f32.mxu1 %vm4072_vm1, %v4071_v8 }
 0x44b   :  { %v595_v21 = vpop.f32.mrb[2].mxu1 }
 0x44c   :  { %v676_v22 = vsel %vm411_vm3, -inf, %v595_v21  ;;  %v3008_v23 = vpop.f32.mrb[3].mxu1  ;;  %v516_v21 = vld [vmem:[#allocation14 + $0x10] sm:$0xff] }
 0x44d   :  { %v679_v24 = vsel %vm678_vm4, %v676_v22, -inf  ;;  %v514_v23 = vld [vmem:[#allocation14] sm:$0xff] }
 0x44e   :  { %680 = vmax.xlane.f32.xlu1 %v679_v24  ;;  %v515_v24 = vld [vmem:[#allocation14 + $0x8] sm:$0xff] }
 0x44f   :  { %v672_v25 = vpop.f32.mrb[4].mxu1 }
 0x450   :  { %v677_v26 = vsel %vm412_vm5, -inf, %v672_v25  ;;  %v3013_v27 = vpop.f32.mrb[5].mxu1  ;;  %v3195_v25 = vpack.c.bf16 %v515_v24, %v514_v23 }
 0x451   :  { %v682_v28 = vsel %vm678_vm4, %v677_v26, -inf }
 0x452   :  { %683 = vmax.xlane.f32.xlu1 %v682_v28 }
 0x463   :  { %703 = vrot.lane.b32.xlu1 %v4615_v12, %s4074_s18 }
 0x467   :  { %779 = vrot.lane.b32.xlu1 %v4619_v13, %s4074_s18 }
 0x46b   :  { %857 = vrot.lane.b32.xlu1 %v4615_v12, %s4075_s13 }
 0x46f   :  { %935 = vrot.lane.b32.xlu1 %v4619_v13, %s4075_s13 }
 0x4db   :  { %v681_v29 = vpop.xlane.xlu1 %680 }
 0x4dc   :  { %v685_v30 = vsub.f32 %v676_v22, %v681_v29 }
 0x4de   :  { %v687_v31 = vmul.f32 1.442695, %v685_v30  ;;  %v2851_v30 = vld [vmem:[#allocation16] ss:$0 sm:$0xff] }
 0x4df   :  { %v684_v32 = vpop.xlane.xlu1 %683 }
 0x4e0   :  { %3352 = vpow2.f32 %v687_v31  ;;  %v686_v33 = vsub.f32 %v677_v26, %v684_v32 }
 0x4e2   :  { %v689_v34 = vmul.f32 1.442695, %v686_v33 }
 0x4e3   :  { %v704_v35 = vpop.permute.xlu1 %703 }
 0x4e4   :  { %3354 = vpow2.f32 %v689_v34  ;;  %3015 = vmatpush3.msra.mxu0 %v704_v35 }
 0x4e5   :  { %3024 = vmatprep.subr.mxu0 %v4071_v8 }
 0x4e7   :  { %v780_v36 = vpop.permute.xlu1 %779 }
 0x4e8   :  { %3020 = vmatpush3.msra.mxu1 %v780_v36 }
 0x4e9   :  { %3029 = vmatprep.subr.mxu1 %v4071_v8 }
 0x4ea   :  { %v3353_v37 = vpop.eup %3352 }
 0x4eb   :  { %v691_v38 = vsel %vm678_vm4, %v3353_v37, 0.0  ;;  %v858_v41 = vpop.permute.xlu1 %857 }
 0x4ec   :  { %692 = vadd.xlane.f32.xlu0 %v691_v38 }
 0x4ee   :  { %v3355_v39 = vpop.eup %3354 }
 0x4ef   :  { %v694_v40 = vsel %vm678_vm4, %v3355_v39, 0.0  ;;  %v936_v42 = vpop.permute.xlu1 %935 }
 0x4f0   :  { %695 = vadd.xlane.f32.xlu1 %v694_v40 }
 0x501   :  { %933 = vrot.lane.b32.xlu1 %v4619_v13, %s4076_s30 }
 0x502   :  { %855 = vrot.lane.b32.xlu0 %v4615_v12, %s4076_s30 }
 0x579   :  { %v693_v43 = vpop.xlane.xlu0 %692 }
 0x57a   :  { %3356 = vrcp.f32 %v693_v43 }
 0x57d   :  { %v696_v44 = vpop.xlane.xlu1 %695  ;;  %v856_v49 = vpop.permute.xlu0 %855 }
 0x57e   :  { %3358 = vrcp.f32 %v696_v44 }
 0x581   :  { %v934_v50 = vpop.permute.xlu1 %933 }
 0x584   :  { %v3357_v45 = vpop.eup %3356 }
 0x585   :  { %v699_v46 = vmul.f32 %v3357_v45, %v3353_v37 }
 0x587   :  { %3017 = vmatmul.mubr.msk.f32.vlgmr.msra.gmra.mrb[0].mxu0 %vm678_vm4, %v699_v46  ;;  %701 = vst.msk [vmem:[#allocation42] sm:$0xff] %vm678_vm4, %v699_v46 }
 0x588   :  { %v3359_v47 = vpop.eup %3358  ;;  %3025 = vmatpush3.xpose.msk.msra.mxu0 %vm524_vm2, %v858_v41  ;;  %3026 = vmatprep.mubr.msk.f32.mxu0 %vm4072_vm1, %v4071_v8 }
 0x589   :  { %v700_v48 = vmul.f32 %v3359_v47, %v3355_v39  ;;  %3034 = vmatprep.subr.mxu0 %v4071_v8  ;;  %v4078_v39 = vmov 0  }
 0x58a   :  { %3321 = vset.pattern.permute.xlu0 %v4078_v39  ;;  %3320 = vset.pattern.permute.xlu1 %v4078_v39 }
 0x58b   :  { %702 = vst.msk [vmem:[#allocation42 + $0x10] sm:$0xff] %vm678_vm4, %v700_v48  ;;  %3022 = vmatmul.mubr.msk.f32.vlgmr.msra.gmra.mrb[6].mxu1 %vm678_vm4, %v700_v48  ;;  %3027 = vmatmul.mubr.msk.f32.vlgmr.msra.gmra.mrb[2].mxu0 %vm524_vm2, %v856_v49  ;;  %v1509_v48 = vld [vmem:[#allocation23] sm:$0xff]  ;;  %v1510_v49 = vld [vmem:[#allocation23 + $0x8] sm:$0xff] }
 0x58c   :  { %3030 = vmatpush3.xpose.msk.msra.mxu1 %vm524_vm2, %v936_v42  ;;  %3031 = vmatprep.mubr.msk.f32.mxu1 %vm4072_vm1, %v4071_v8 }
 0x58d   :  { %3039 = vmatprep.subr.mxu1 %v4071_v8  ;;  %3036 = vmatprep.mubr.msk.f32.mxu0 %vm4072_vm1, %v4071_v8 }
 0x58f   :  { %3032 = vmatmul.mubr.msk.f32.vlgmr.msra.gmra.mrb[8].mxu1 %vm524_vm2, %v934_v50  ;;  %v403_v50 = vld [vmem:[#allocation7] sm:$0xff] }
 0x590   :  { %3041 = vmatprep.mubr.msk.f32.mxu1 %vm4072_vm1, %v4071_v8 }
 0x65a   :  { %v4679_v51 = vpop.f32.mrb[0].mxu0 }
 0x65b   :  { %v3018_v52 = vpop.f32.mrb[1].mxu0 }
 0x65c   :  { %v1511_v52 = vld [vmem:[#allocation23 + $0x10] sm:$0xff] }
 0x65e   :  { %v851_v53 = vpop.f32.mrb[6].mxu1  ;;  %v929_v54 = vpop.f32.mrb[2].mxu0 }
 0x65f   :  { %v1011_v55 = vsel %vm411_vm3, -inf, %v929_v54  ;;  %v3023_v56 = vpop.f32.mrb[7].mxu1  ;;  %v3028_v57 = vpop.f32.mrb[3].mxu0  ;;  %v404_v54 = vld [vmem:[#allocation7 + $0x8] sm:$0xff] }
 0x660   :  { %v1013_v58 = vsel %vm678_vm4, %v1011_v55, -inf  ;;  %v399_v56 = vld [vmem:[#allocation5] sm:$0xff] }
 0x661   :  { %1014 = vmax.xlane.f32.xlu1 %v1013_v58  ;;  %v1417_v57 = vld [vmem:[#allocation20] sm:$0xff]  ;;  %v1418_v58 = vld [vmem:[#allocation20 + $0x8] sm:$0xff] }
 0x662   :  { %v1007_v59 = vpop.f32.mrb[8].mxu1 }
 0x663   :  { %v1012_v60 = vsel %vm412_vm5, -inf, %v1007_v59  ;;  %v3033_v61 = vpop.f32.mrb[9].mxu1  ;;  %v3199_v59 = vpack.c.bf16 %v1418_v58, %v1417_v57 }
 0x664   :  { %v1016_v62 = vsel %vm678_vm4, %v1012_v60, -inf  ;;  %v401_v61 = vld [vmem:[#allocation5 + $0x10] sm:$0xff] }
 0x665   :  { %1017 = vmax.xlane.f32.xlu0 %v1016_v62  ;;  %v402_v62 = vld [vmem:[#allocation5 + $0x18] sm:$0xff] }
 0x67b   :  { %1114 = vrot.lane.b32.xlu0 %v4619_v13, %s4077_s8 }
 0x6ee   :  { %v1015_v63 = vpop.xlane.xlu1 %1014 }
 0x6ef   :  { %v1019_v0 = vsub.f32 %v1011_v55, %v1015_v63  ;;  %v1419_v63 = vld [vmem:[#allocation20 + $0x10] sm:$0xff] }
 0x6f1   :  { %v1021_v1 = vmul.f32 1.442695, %v1019_v0  ;;  %v1420_v0 = vld [vmem:[#allocation20 + $0x18] sm:$0xff] }
 0x6f2   :  { %v1018_v2 = vpop.xlane.xlu0 %1017 }
 0x6f3   :  { %3360 = vpow2.f32 %v1021_v1  ;;  %v1020_v3 = vsub.f32 %v1012_v60, %v1018_v2  ;;  %v400_v60 = vld [vmem:[#allocation5 + $0x8] sm:$0xff]  ;;  %v3203_v1 = vpack.c.bf16 %v1420_v0, %v1419_v63  ;;  %v4079_v2 = vmov 0.0|0.0  }
 0x6f5   :  { %v1023_v4 = vmul.f32 1.442695, %v1020_v3 }
 0x6f6   :  { %v1115_v6 = vpop.permute.xlu0 %1114 }
 0x6f7   :  { %3362 = vpow2.f32 %v1023_v4  ;;  %3040 = vmatpush3.msra.mxu1 %v1115_v6 }
 0x6f8   :  { %3200 = vmatprep.subr.bf16.mxu1 %v3199_v59 }
 0x6fd   :  { %v3361_v9 = vpop.eup %3360 }
 0x6fe   :  { %v1025_v10 = vsel %vm678_vm4, %v3361_v9, 0.0 }
 0x6ff   :  { %1026 = vadd.xlane.f32.xlu1 %v1025_v10 }
 0x701   :  { %v3363_v11 = vpop.eup %3362 }
 0x702   :  { %v1028_v14 = vsel %vm678_vm4, %v3363_v11, 0.0 }
 0x703   :  { %1029 = vadd.xlane.f32.xlu1 %v1028_v14 }
 0x714   :  { %1038 = vrot.lane.b32.xlu1 %v4615_v12, %s4077_s8  ;;  %v517_v12 = vld [vmem:[#allocation14 + $0x18] sm:$0xff] }
 0x715   :  { %v3191_v22 = vpack.c.bf16 %v517_v12, %v516_v21 }
 0x78c   :  { %v1027_v13 = vpop.xlane.xlu1 %1026 }
 0x78d   :  { %3364 = vrcp.f32 %v1027_v13  ;;  %v2852_v13 = vld [vmem:[#allocation17] ss:$0 sm:$0xff] }
 0x790   :  { %v1030_v15 = vpop.xlane.xlu1 %1029 }
 0x791   :  { %3366 = vrcp.f32 %v1030_v15 }
 0x794   :  { %v1039_v16 = vpop.permute.xlu1 %1038 }
 0x795   :  { %3035 = vmatpush3.msra.mxu0 %v1039_v16 }
 0x796   :  { %3192 = vmatprep.subr.bf16.mxu0 %v3191_v22 }
 0x797   :  { %v3365_v17 = vpop.eup %3364 }
 0x798   :  { %v1033_v18 = vmul.f32 %v3365_v17, %v3361_v9  ;;  %v2853_v17 = vld [vmem:[#allocation19] ss:$0 sm:$0xff] }
 0x79a   :  { %1036 = vst.msk [vmem:[#allocation42 + $0x8] sm:$0xff] %vm678_vm4, %v1033_v18  ;;  %3037 = vmatmul.mubr.msk.f32.vlgmr.msra.gmra.mrb[4].mxu0 %vm678_vm4, %v1033_v18 }
 0x79b   :  { %v3367_v19 = vpop.eup %3366  ;;  %3194 = vmatpush3.bf16.msra.mxu0 %v3191_v22 }
 0x79c   :  { %v1034_v20 = vmul.f32 %v3367_v19, %v3363_v11  ;;  %3196 = vmatprep.subr.bf16.mxu0 %v3195_v25 }
 0x79e   :  { %1037 = vst.msk [vmem:[#allocation42 + $0x18] sm:$0xff] %vm678_vm4, %v1034_v20  ;;  %3042 = vmatmul.mubr.msk.f32.vlgmr.msra.gmra.mrb[10].mxu1 %vm678_vm4, %v1034_v20 }
 0x79f   :  { %3202 = vmatpush3.bf16.msra.mxu1 %v3199_v59 }
 0x7a0   :  { %3204 = vmatprep.subr.bf16.mxu1 %v3203_v1 }
 0x7a3   :  { %3206 = vmatpush3.bf16.msra.mxu1 %v3203_v1 }
 0x7a4   :  { %3215 = vmatprep.subr.bf16.mxu1 %v4079_v2 }
 0x86d   :  { %v1110_v26 = vpop.f32.mrb[4].mxu0 }
 0x86e   :  { %v3038_v27 = vpop.f32.mrb[5].mxu0  ;;  %3048 = vmatprep.mubr.msk.f32.mxu0 %vm524_vm2, %v1110_v26  ;;  %v2857_v26 = vld [vmem:[#allocation25] ss:$0 sm:$0xff] }
 0x871   :  { %v1186_v28 = vpop.f32.mrb[10].mxu1 }
 0x872   :  { %v3043_v29 = vpop.f32.mrb[11].mxu1  ;;  %3049 = vmatmul.mubr.msk.f32.vlgmr.msra.gmra.mrb[6].mxu0 %vm524_vm2, %v1186_v28 }
 0x873   :  { %3198 = vmatpush3.bf16.msra.mxu0 %v3195_v25  ;;  %3055 = vmatprep.mubr.msk.f32.mxu0 %vm524_vm2, %v4679_v51  ;;  %v3207_v51 = vpack.c.bf16 %v1510_v49, %v1509_v48 }
 0x875   :  { %3208 = vmatprep.subr.bf16.mxu0 %v3207_v51 }
 0x87a   :  { %3056 = vmatmul.mubr.msk.f32.vlgmr.msra.gmra.mrb[6].mxu0 %vm524_vm2, %v851_v53  ;;  %v1512_v53 = vld [vmem:[#allocation23 + $0x18] sm:$0xff] }
 0x87b   :  { %3210 = vmatpush3.bf16.msra.mxu0 %v3207_v51  ;;  %v3211_v55 = vpack.c.bf16 %v1512_v53, %v1511_v52  ;;  %3077 = vmatprep.mubr.msk.f32.mxu0 %vm432_vm0, %v399_v56 }
 0x87d   :  { %3212 = vmatprep.subr.bf16.mxu0 %v3211_v55 }
 0x87f   :  { %3214 = vmatpush3.bf16.msra.mxu0 %v3211_v55 }
 0x880   :  { %3219 = vmatprep.subr.bf16.mxu0 %v4079_v2 }
 0x882   :  { %3078 = vmatmul.mubr.msk.f32.vlgmr.msra.gmra.mrb[8].mxu0 %vm432_vm0, %v400_v60 }
 0x883   :  { %3080 = vmatprep.mubr.msk.f32.mxu0 %vm432_vm0, %v401_v61 }
 0x886   :  { %3081 = vmatmul.mubr.msk.f32.gmra.mrb[10].mxu0 %vm432_vm0, %v402_v62 }
 0x887   :  { %3094 = vmatprep.mubr.msk.f32.mxu0 %vm4072_vm1, %v4071_v8 }
 0x94d   :  { %v3057_v31 = vpop.f32.mrb[6].mxu0 }
 0x94e   :  { %v1359_v32 = vadd.f32 %v3057_v31, %v2851_v30  ;;  %v1343_v33 = vpop.f32.mrb[7].mxu0 }
 0x94f   :  { %v1358_v34 = vadd.f32 %v2851_v30, %v1343_v33 }
 0x950   :  { %v1361_v35 = vadd.f32 %v1359_v32, %v4605_v7 }
 0x951   :  { %v1360_v36 = vadd.f32 %v1358_v34, %v4601_v5 }
 0x952   :  { %v1365_v37 = vsel %vm432_vm0, %v1361_v35, 0.0 }
 0x953   :  { %1366 = vadd.xlane.f32.xlu0 %v1365_v37  ;;  %v1362_v38 = vsel %vm432_vm0, %v1360_v36, 0.0 }
 0x954   :  { %1363 = vadd.xlane.f32.xlu1 %v1362_v38 }
 0x955   :  { %v3079_v27 = vpop.f32.mrb[8].mxu0 }
 0x956   :  { %v1604_v28 = vadd.f32 %v3079_v27, %v2857_v26  ;;  %v1598_v29 = vpop.f32.mrb[9].mxu0 }
 0x957   :  { %v1599_v30 = vadd.f32 %v2857_v26, %v1598_v29 }
 0x959   :  { %v3216_v32 = vpack.c.bf16 %v1604_v28, %v1599_v30  ;;  %v3082_v33 = vpop.f32.mrb[10].mxu0  ;;  %v4736_v34 = vpack.i.bf16 %v1604_v28, %v1599_v30 }
 0x9e0   :  { %v1367_v40 = vpop.xlane.xlu0 %1366 }
 0x9e1   :  { %v1370_v41 = vmul.f32 0.03125, %v1367_v40  ;;  %v1364_v42 = vpop.xlane.xlu1 %1363  ;;  %v2854_v40 = vld [vmem:[#allocation22] ss:$0 sm:$0xff] }
 0x9e2   :  { %v1369_v43 = vmul.f32 0.03125, %v1364_v42 }
 0x9e3   :  { %v1372_v44 = vsub.f32 %v1361_v35, %v1370_v41  ;;  %v1614_v35 = vadd.f32 %v3082_v33, %v2857_v26 }
 0x9e4   :  { %v1371_v45 = vsub.f32 %v1360_v36, %v1369_v43  ;;  %v1608_v36 = vpop.f32.mrb[11].mxu0 }
 0x9e5   :  { %v1374_v46 = vmul.f32 %v1372_v44, %v1372_v44  ;;  %v1609_v37 = vadd.f32 %v2857_v26, %v1608_v36 }
 0x9e6   :  { %v1373_v47 = vmul.f32 %v1371_v45, %v1371_v45 }
 0x9e7   :  { %v1378_v7 = vsel %vm432_vm0, %v1374_v46, 0.0  ;;  %v3220_v38 = vpack.c.bf16 %v1614_v35, %v1609_v37  ;;  %v4741_v39 = vpack.i.bf16 %v1614_v35, %v1609_v37 }
 0x9e8   :  { %1379 = vadd.xlane.f32.xlu0 %v1378_v7  ;;  %v1375_v5 = vsel %vm432_vm0, %v1373_v47, 0.0 }
 0x9e9   :  { %1376 = vadd.xlane.f32.xlu1 %v1375_v5  ;;  %3222 = vmatpush3.bf16.xpose.msk.msra.mxu0 %vm4732_vm6, %v3220_v38 }
 0x9ea   :  { %3229 = vmatprep.subr.bf16.mxu0 %v4079_v2 }
 0x9fa   :  { %1407 = vperm.xlu1 %3320, %v403_v50  }
 0x9fe   :  { %1412 = vperm.xlu0 %3321, %v404_v54  }
 0xa75   :  { %v1380_v3 = vpop.xlane.xlu0 %1379 }
 0xa76   :  { %v1382_v4 = vmul.f32 0.03125, %v1380_v3  ;;  %v1377_v6 = vpop.xlane.xlu1 %1376 }
 0xa77   :  { %v1381_v9 = vmul.f32 0.03125, %v1377_v6 }
 0xa78   :  { %v1384_v10 = vadd.f32 1e-05, %v1382_v4 }
 0xa79   :  { %v1383_v11 = vadd.f32 1e-05, %v1381_v9 }
 0xa7a   :  { %3368 = vrsqrt.f32 %v1384_v10  ;;  %v4714_v12 = vpop.permute.xlu1 %1407 }
 0xa7b   :  { %3370 = vrsqrt.f32 %v1383_v11 }
 0xa7d   :  { %v4716_v22 = vpop.permute.xlu0 %1412 }
 0xa84   :  { %v3369_v14 = vpop.eup %3368 }
 0xa85   :  { %v3371_v15 = vpop.eup %3370  ;;  %v1388_v16 = vmul.f32 %v3369_v14, %v1372_v44 }
 0xa86   :  { %v1387_v18 = vmul.f32 %v3371_v15, %v1371_v45  ;;  %v2898_v45 = vld [vmem:[#allocation10] sm:$0xf]  }
 0xa87   :  { %v1396_v19 = vmul.f32 %v2852_v13, %v1388_v16  ;;  %v2900_v46 = vunpack.c.1.s8 %v2898_v45  ;;  %v2899_v47 = vunpack.c.0.s8 %v2898_v45 }
 0xa88   :  { %v1395_v20 = vmul.f32 %v2852_v13, %v1387_v18 }
 0xa89   :  { %v1404_v21 = vadd.f32 %v2853_v17, %v1396_v19  ;;  %v4752_v7 = vcvt.s32.f32 %v2900_v46  ;;  %v4754_v5 = vcvt.s32.f32 %v2899_v47 }
 0xa8a   :  { %v1403_v23 = vadd.f32 %v2853_v17, %v1395_v20 }
 0xa8b   :  { %v4722_v25 = vmul.f32 %v4716_v22, %v1404_v21  ;;  %vm420_vm7 = vcmp.gt.f32.partialorder %v4752_v7, 0.0  ;;  %vm419_vm8 = vcmp.gt.f32.partialorder %v4754_v5, 0.0 }
 0xa8c   :  { %v4719_v24 = vmul.f32 %v4714_v12, %v1403_v23 }
 0xa8e   :  { %3066 = vmatprep.mubr.msk.f32.mxu1 %vm432_vm0, %v4719_v24 }
 0xa8f   :  { %3067 = vmatmul.mubr.msk.f32.vlgmr.msra.gmra.mrb[12].mxu1 %vm432_vm0, %v4722_v25 }
 0xa90   :  { %3087 = vmatprep.mubr.msk.f32.mxu1 %vm4072_vm1, %v4071_v8  ;;  %3218 = vmatpush3.bf16.xpose.msk.msra.mxu1 %vm4732_vm6, %v3216_v32 }
 0xa91   :  { %3223 = vmatprep.subr.bf16.mxu1 %v4079_v2 }
 0xb62   :  { %v3068_v41 = vpop.f32.mrb[12].mxu1 }
 0xb63   :  { %v1506_v42 = vadd.f32 %v3068_v41, %v2854_v40  ;;  %v1500_v43 = vpop.f32.mrb[13].mxu1 }
 0xb64   :  { %v1501_v44 = vadd.f32 %v2854_v40, %v1500_v43 }
 0xb65   :  { %3095 = vmatmul.mubr.msk.f32.vlgmr.msra.gmra.mrb[12].mxu0 %vm524_vm2, %v1506_v42 }
 0xb66   :  { %3088 = vmatmul.mubr.msk.f32.vlgmr.msra.gmra.mrb[14].mxu1 %vm524_vm2, %v1501_v44  ;;  %3115 = vmatprep.mubr.msk.f32.mxu0 %vm4072_vm1, %v4071_v8 }
 0xb67   :  { %3101 = vmatprep.mubr.msk.f32.mxu1 %vm4072_vm1, %v4071_v8 }
 0xc38   :  { %v1778_v48 = vpop.f32.mrb[12].mxu0 }
 0xc39   :  { %v1783_v49 = vsel %vm420_vm7, -inf, %v1778_v48  ;;  %v1699_v50 = vpop.f32.mrb[14].mxu1  ;;  %v3096_v51 = vpop.f32.mrb[13].mxu0 }
 0xc3a   :  { %v1782_v52 = vsel %vm419_vm8, -inf, %v1699_v50  ;;  %v3089_v53 = vpop.f32.mrb[15].mxu1  ;;  %v1787_v54 = vsel %vm524_vm2, %v1783_v49, -inf }
 0xc3b   :  { %1788 = vmax.xlane.f32.xlu0 %v1787_v54  ;;  %v1784_v55 = vsel %vm524_vm2, %v1782_v52, -inf }
 0xc3c   :  { %1785 = vmax.xlane.f32.xlu1 %v1784_v55 }
 0xc4d   :  { %3323 = vrot.lane.b32.xlu1 %v4736_v34, %s4073_s24 }
 0xc51   :  { %3328 = vrot.lane.b32.xlu0 %v4741_v39, %s4073_s24  ;;  %3333 = vrot.lane.b32.xlu1 %v4736_v34, %s4076_s30 }
 0xcc8   :  { %v1789_v56 = vpop.xlane.xlu0 %1788 }
 0xcc9   :  { %v1791_v57 = vsub.f32 %v1783_v49, %v1789_v56  ;;  %v1786_v58 = vpop.xlane.xlu1 %1785 }
 0xcca   :  { %v1790_v59 = vsub.f32 %v1782_v52, %v1786_v58 }
 0xccb   :  { %v1794_v60 = vmul.f32 1.442695, %v1791_v57 }
 0xccc   :  { %v1792_v61 = vmul.f32 1.442695, %v1790_v59  ;;  %v3329_v18 = vpop.permute.xlu0 %3328 }
 0xccd   :  { %3372 = vpow2.f32 %v1794_v60  ;;  %v3324_v62 = vpop.permute.xlu1 %3323  ;;  %v3331_v23 = vunpack.i.h.bf16 %v3329_v18  ;;  %v3330_v26 = vunpack.i.l.bf16 %v3329_v18 }
 0xcce   :  { %v3326_v63 = vunpack.i.h.bf16 %v3324_v62  ;;  %v3325_v0 = vunpack.i.l.bf16 %v3324_v62  ;;  %3374 = vpow2.f32 %v1792_v61 }
 0xccf   :  { %v3227_v29 = vpack.c.bf16 %v3331_v23, %v3330_v26 }
 0xcd0   :  { %v3224_v1 = vpack.c.bf16 %v3326_v63, %v3325_v0 }
 0xcd1   :  { %v3334_v3 = vpop.permute.xlu1 %3333 }
 0xcd2   :  { %v3336_v4 = vunpack.i.h.bf16 %v3334_v3  ;;  %v3335_v6 = vunpack.i.l.bf16 %v3334_v3  ;;  %3225 = vmatpush3.bf16.msra.mxu1 %v3224_v1  ;;  %v1619_v3 = vld [vmem:[#allocation26 + $0x10] sm:$0xff] }
 0xcd3   :  { %3226 = vmatprep.subr.bf16.mxu1 %v4079_v2 }
 0xcd4   :  { %v3230_v9 = vpack.c.bf16 %v3336_v4, %v3335_v6  ;;  %v1620_v4 = vld [vmem:[#allocation26 + $0x18] sm:$0xff] }
 0xcd5   :  { %v3243_v6 = vpack.c.bf16 %v1620_v4, %v1619_v3  ;;  %v2631_v3 = vld [vmem:[#allocation35 + $0x30] sm:$0xff]  ;;  %v2632_v4 = vld [vmem:[#allocation35 + $0x38] sm:$0xff] }
 0xcd6   :  { %3232 = vmatpush3.bf16.xpose.msk.msra.mxu0 %vm4732_vm6, %v3230_v9  ;;  %v1617_v9 = vld [vmem:[#allocation26] sm:$0xff] }
 0xcd7   :  { %v3373_v10 = vpop.eup %3372  ;;  %3237 = vmatprep.subr.bf16.mxu0 %v4079_v2 }
 0xcd8   :  { %v1799_v11 = vsel %vm524_vm2, %v3373_v10, 0.0  ;;  %v3375_v14 = vpop.eup %3374 }
 0xcd9   :  { %1800 = vadd.xlane.f32.xlu1 %v1799_v11  ;;  %v1796_v13 = vsel %vm524_vm2, %v3375_v14, 0.0 }
 0xcdd   :  { %1797 = vadd.xlane.f32.xlu1 %v1796_v13 }
 0xcee   :  { %3338 = vrot.lane.b32.xlu1 %v4741_v39, %s4076_s30 }
 0xcf2   :  { %1966 = vrot.lane.b32.xlu1 %v1501_v44, %s4076_s30 }
 0xcf6   :  { %2048 = vrot.lane.b32.xlu1 %v1506_v42, %s4076_s30 }
 0xd66   :  { %v1801_v15 = vpop.xlane.xlu1 %1800 }
 0xd67   :  { %3376 = vrcp.f32 %v1801_v15 }
 0xd6a   :  { %v1798_v16 = vpop.xlane.xlu1 %1797 }
 0xd6b   :  { %3378 = vrcp.f32 %v1798_v16 }
 0xd6e   :  { %v3339_v17 = vpop.permute.xlu1 %3338 }
 0xd6f   :  { %v3341_v30 = vunpack.i.h.bf16 %v3339_v17  ;;  %v3340_v32 = vunpack.i.l.bf16 %v3339_v17  ;;  %v2882_v17 = vld [vmem:[#allocation28] ss:$0 sm:$0xff] }
 0xd71   :  { %v3377_v19 = vpop.eup %3376  ;;  %v3234_v33 = vpack.c.bf16 %v3341_v30, %v3340_v32 }
 0xd72   :  { %v1805_v20 = vmul.f32 %v3377_v19, %v3373_v10  ;;  %v1967_v21 = vpop.permute.xlu1 %1966  ;;  %v1618_v10 = vld [vmem:[#allocation26 + $0x8] sm:$0xff] }
 0xd73   :  { %3116 = vmatmul.mubr.msk.f32.vlgmr.msra.gmra.mrb[14].mxu0 %vm524_vm2, %v1967_v21  ;;  %v3247_v11 = vpack.c.bf16 %v1618_v10, %v1617_v9  ;;  %v2885_v9 = vld [vmem:[#allocation34] ss:$0 sm:$0xff] }
 0xd74   :  { %1807 = vst.msk [vmem:[#allocation44 + $0x10] sm:$0xff] %vm524_vm2, %v1805_v20  ;;  %3129 = vmatprep.mubr.msk.f32.mxu0 %vm4072_vm1, %v4071_v8 }
 0xd75   :  { %v3379_v27 = vpop.eup %3378 }
 0xd76   :  { %v1804_v28 = vmul.f32 %v3379_v27, %v3375_v14  ;;  %v2049_v35 = vpop.permute.xlu1 %2048 }
 0xd78   :  { %1806 = vst.msk [vmem:[#allocation44] sm:$0xff] %vm524_vm2, %v1804_v28  ;;  %3102 = vmatmul.mubr.msk.f32.vlgmr.msra.gmra.mrb[16].mxu1 %vm524_vm2, %v1804_v28 }
 0xd79   :  { %3228 = vmatpush3.bf16.msra.mxu1 %v3227_v29  ;;  %3108 = vmatprep.mubr.msk.f32.mxu1 %vm4072_vm1, %v4071_v8 }
 0xd7a   :  { %3233 = vmatprep.subr.bf16.mxu1 %v4079_v2 }
 0xd7c   :  { %3109 = vmatmul.mubr.msk.f32.vlgmr.msra.gmra.mrb[18].mxu1 %vm524_vm2, %v1805_v20 }
 0xd7d   :  { %3122 = vmatprep.mubr.msk.f32.mxu1 %vm4072_vm1, %v4071_v8 }
 0xd82   :  { %3236 = vmatpush3.bf16.xpose.msk.msra.mxu1 %vm4732_vm6, %v3234_v33 }
 0xd83   :  { %3240 = vmatprep.subr.bf16.mxu1 %v4079_v2 }
 0xd89   :  { %3123 = vmatmul.mubr.msk.f32.vlgmr.msra.gmra.mrb[20].mxu1 %vm524_vm2, %v2049_v35 }
 0xd8a   :  { %3136 = vmatprep.mubr.msk.f32.mxu1 %vm4072_vm1, %v4071_v8 }
 0xe46   :  { %v2044_v36 = vpop.f32.mrb[14].mxu0 }
 0xe47   :  { %v2130_v37 = vsel %vm419_vm8, -inf, %v2044_v36  ;;  %v3117_v38 = vpop.f32.mrb[15].mxu0 }
 0xe48   :  { %v2132_v40 = vsel %vm524_vm2, %v2130_v37, -inf }
 0xe49   :  { %2133 = vmax.xlane.f32.xlu1 %v2132_v40 }
 0xe4b   :  { %v4801_v41 = vpop.f32.mrb[16].mxu1 }
 0xe4c   :  { %v3103_v31 = vpop.f32.mrb[17].mxu1 }
 0xe4f   :  { %v1962_v42 = vpop.f32.mrb[18].mxu1 }
 0xe50   :  { %v3110_v43 = vpop.f32.mrb[19].mxu1 }
 0xe51   :  { %v2534_v43 = vld [vmem:[#allocation32 + $0x18] sm:$0xff] }
 0xe5c   :  { %v2126_v2 = vpop.f32.mrb[20].mxu1 }
 0xe5d   :  { %v2131_v44 = vsel %vm420_vm7, -inf, %v2126_v2  ;;  %v3124_v45 = vpop.f32.mrb[21].mxu1 }
 0xe5e   :  { %v2135_v8 = vsel %vm524_vm2, %v2131_v44, -inf  ;;  %v2626_v45 = vld [vmem:[#allocation35 + $0x8] sm:$0xff] }
 0xe5f   :  { %2136 = vmax.xlane.f32.xlu0 %v2135_v8  ;;  %v2627_v8 = vld [vmem:[#allocation35 + $0x10] sm:$0xff] }
 0xed6   :  { %v2134_v46 = vpop.xlane.xlu1 %2133 }
 0xed7   :  { %v2138_v47 = vsub.f32 %v2130_v37, %v2134_v46 }
 0xed9   :  { %v2140_v5 = vmul.f32 1.442695, %v2138_v47  ;;  %v2628_v47 = vld [vmem:[#allocation35 + $0x18] sm:$0xff] }
 0xedb   :  { %3380 = vpow2.f32 %v2140_v5  ;;  %v3263_v5 = vpack.c.bf16 %v2628_v47, %v2627_v8 }
 0xee5   :  { %v3381_v48 = vpop.eup %3380 }
 0xee6   :  { %v2144_v49 = vsel %vm524_vm2, %v3381_v48, 0.0 }
 0xee7   :  { %2145 = vadd.xlane.f32.xlu1 %v2144_v49  ;;  %v2630_v49 = vld [vmem:[#allocation35 + $0x28] sm:$0xff] }
 0xeec   :  { %v2137_v50 = vpop.xlane.xlu0 %2136 }
 0xeed   :  { %v2139_v51 = vsub.f32 %v2131_v44, %v2137_v50  ;;  %v2625_v44 = vld [vmem:[#allocation35] sm:$0xff] }
 0xeee   :  { %v3259_v46 = vpack.c.bf16 %v2626_v45, %v2625_v44 }
 0xeef   :  { %v2142_v52 = vmul.f32 1.442695, %v2139_v51 }
 0xef1   :  { %3382 = vpow2.f32 %v2142_v52 }
 0xef8   :  { %3343 = vrot.lane.b32.xlu1 %v4736_v34, %s4075_s13 }
 0xefb   :  { %v3383_v7 = vpop.eup %3382 }
 0xefc   :  { %v2147_v53 = vsel %vm524_vm2, %v3383_v7, 0.0 }
 0xefd   :  { %2148 = vadd.xlane.f32.xlu0 %v2147_v53 }
 0xf13   :  { %3348 = vrot.lane.b32.xlu0 %v4741_v39, %s4075_s13 }
 0xf74   :  { %v2146_v54 = vpop.xlane.xlu1 %2145 }
 0xf75   :  { %3384 = vrcp.f32 %v2146_v54 }
 0xf78   :  { %v3344_v55 = vpop.permute.xlu1 %3343 }
 0xf79   :  { %v3346_v56 = vunpack.i.h.bf16 %v3344_v55  ;;  %v3345_v57 = vunpack.i.l.bf16 %v3344_v55 }
 0xf7b   :  { %v3238_v58 = vpack.c.bf16 %v3346_v56, %v3345_v57  ;;  %v2883_v57 = vld [vmem:[#allocation29] ss:$0 sm:$0xff] }
 0xf7d   :  { %3239 = vmatpush3.bf16.msra.mxu0 %v3238_v58 }
 0xf7e   :  { %3244 = vmatprep.subr.bf16.mxu0 %v3243_v6 }
 0xf7f   :  { %v3385_v59 = vpop.eup %3384 }
 0xf80   :  { %v2152_v60 = vmul.f32 %v3385_v59, %v3381_v48  ;;  %v2629_v48 = vld [vmem:[#allocation35 + $0x20] sm:$0xff] }
 0xf81   :  { %v3267_v50 = vpack.c.bf16 %v2630_v49, %v2629_v48 }
 0xf82   :  { %2155 = vst.msk [vmem:[#allocation44 + $0x8] sm:$0xff] %vm524_vm2, %v2152_v60  ;;  %3130 = vmatmul.mubr.msk.f32.vlgmr.msra.gmra.mrb[16].mxu0 %vm524_vm2, %v2152_v60 }
 0xf83   :  { %3246 = vmatpush3.bf16.msra.mxu0 %v3243_v6  ;;  %v3271_v6 = vpack.c.bf16 %v2632_v4, %v2631_v3 }
 0xf84   :  { %3248 = vmatprep.subr.bf16.mxu0 %v3247_v11 }
 0xf8a   :  { %v2149_v34 = vpop.xlane.xlu0 %2148 }
 0xf8b   :  { %3386 = vrcp.f32 %v2149_v34  ;;  %v2884_v34 = vld [vmem:[#allocation31] ss:$0 sm:$0xff] }
 0xf8e   :  { %v3349_v61 = vpop.permute.xlu0 %3348 }
 0xf8f   :  { %v3351_v62 = vunpack.i.h.bf16 %v3349_v61  ;;  %v3350_v63 = vunpack.i.l.bf16 %v3349_v61 }
 0xf91   :  { %v3241_v0 = vpack.c.bf16 %v3351_v62, %v3350_v63 }
 0xf93   :  { %3242 = vmatpush3.bf16.msra.mxu1 %v3241_v0 }
 0xf95   :  { %v3387_v39 = vpop.eup %3386 }
 0xf96   :  { %v2153_v1 = vmul.f32 %v3387_v39, %v3383_v7 }
 0xf98   :  { %2156 = vst.msk [vmem:[#allocation44 + $0x18] sm:$0xff] %vm524_vm2, %v2153_v1  ;;  %3137 = vmatmul.mubr.msk.f32.vlgmr.msra.gmra.mrb[22].mxu1 %vm524_vm2, %v2153_v1 }
0x1055   :  { %v2232_v14 = vpop.f32.mrb[16].mxu0 }
0x1056   :  { %v3131_v13 = vpop.f32.mrb[17].mxu0  ;;  %3143 = vmatprep.mubr.msk.f32.mxu0 %vm524_vm2, %v2232_v14 }
0x106b   :  { %v2311_v15 = vpop.f32.mrb[22].mxu1 }
0x106c   :  { %v3138_v16 = vpop.f32.mrb[23].mxu1  ;;  %3144 = vmatmul.mubr.msk.f32.vlgmr.msra.gmra.mrb[18].mxu0 %vm524_vm2, %v2311_v15 }
0x106d   :  { %3250 = vmatpush3.bf16.msra.mxu0 %v3247_v11  ;;  %3150 = vmatprep.mubr.msk.f32.mxu0 %vm524_vm2, %v4801_v41  ;;  %v2532_v41 = vld [vmem:[#allocation32 + $0x8] sm:$0xff] }
0x106e   :  { %3260 = vmatprep.subr.bf16.mxu0 %v3259_v46 }
0x1074   :  { %3151 = vmatmul.mubr.msk.f32.vlgmr.msra.gmra.mrb[18].mxu0 %vm524_vm2, %v1962_v42  ;;  %v2533_v42 = vld [vmem:[#allocation32 + $0x10] sm:$0xff] }
0x1075   :  { %v3255_v2 = vpack.c.bf16 %v2534_v43, %v2533_v42  ;;  %3262 = vmatpush3.bf16.msra.mxu0 %v3259_v46 }
0x1076   :  { %3264 = vmatprep.subr.bf16.mxu0 %v3263_v5 }
0x1079   :  { %3266 = vmatpush3.bf16.msra.mxu0 %v3263_v5 }
0x107a   :  { %3268 = vmatprep.subr.bf16.mxu0 %v3267_v50 }
0x107d   :  { %3270 = vmatpush3.bf16.msra.mxu0 %v3267_v50 }
0x107e   :  { %3272 = vmatprep.subr.bf16.mxu0 %v3271_v6 }
0x1081   :  { %3274 = vmatpush3.bf16.msra.mxu0 %v3271_v6 }
0x1147   :  { %v3152_v18 = vpop.f32.mrb[18].mxu0 }
0x1148   :  { %v2484_v19 = vadd.f32 %v3152_v18, %v2882_v17  ;;  %v2468_v20 = vpop.f32.mrb[19].mxu0 }
0x1149   :  { %v2483_v21 = vadd.f32 %v2882_v17, %v2468_v20  ;;  %v2888_v17 = vld [vmem:[#allocation37] ss:$0 sm:$0xff] }
0x114a   :  { %v2486_v23 = vadd.f32 %v2484_v19, %v4722_v25 }
0x114b   :  { %v2485_v26 = vadd.f32 %v2483_v21, %v4719_v24  ;;  %v2531_v24 = vld [vmem:[#allocation32] sm:$0xff] }
0x114c   :  { %v2490_v27 = vsel %vm432_vm0, %v2486_v23, 0.0  ;;  %v3251_v31 = vpack.c.bf16 %v2532_v41, %v2531_v24 }
0x114d   :  { %2491 = vadd.xlane.f32.xlu0 %v2490_v27  ;;  %v2487_v28 = vsel %vm432_vm0, %v2485_v26, 0.0 }
0x114e   :  { %2488 = vadd.xlane.f32.xlu1 %v2487_v28  ;;  %3252 = vmatprep.subr.bf16.mxu1 %v3251_v31 }
0x114f   :  { %3254 = vmatpush3.bf16.msra.mxu1 %v3251_v31 }
0x1150   :  { %3256 = vmatprep.subr.bf16.mxu1 %v3255_v2 }
0x1153   :  { %3258 = vmatpush3.bf16.msra.mxu1 %v3255_v2 }
0x11da   :  { %v2492_v29 = vpop.xlane.xlu0 %2491 }
0x11db   :  { %v2494_v30 = vmul.f32 0.03125, %v2492_v29  ;;  %v2489_v32 = vpop.xlane.xlu1 %2488 }
0x11dc   :  { %v2493_v33 = vmul.f32 0.03125, %v2489_v32 }
0x11dd   :  { %v2496_v35 = vsub.f32 %v2486_v23, %v2494_v30 }
0x11de   :  { %v2495_v36 = vsub.f32 %v2485_v26, %v2493_v33 }
0x11df   :  { %v2498_v37 = vmul.f32 %v2496_v35, %v2496_v35 }
0x11e0   :  { %v2497_v38 = vmul.f32 %v2495_v36, %v2495_v36 }
0x11e1   :  { %v2502_v40 = vsel %vm432_vm0, %v2498_v37, 0.0 }
0x11e2   :  { %2503 = vadd.xlane.f32.xlu0 %v2502_v40  ;;  %v2499_v25 = vsel %vm432_vm0, %v2497_v38, 0.0 }
0x11e3   :  { %2500 = vadd.xlane.f32.xlu1 %v2499_v25 }
0x126f   :  { %v2504_v51 = vpop.xlane.xlu0 %2503 }
0x1270   :  { %v2506_v52 = vmul.f32 0.03125, %v2504_v51  ;;  %v2501_v7 = vpop.xlane.xlu1 %2500 }
0x1271   :  { %v2505_v53 = vmul.f32 0.03125, %v2501_v7 }
0x1272   :  { %v2508_v54 = vadd.f32 1e-05, %v2506_v52 }
0x1273   :  { %v2507_v55 = vadd.f32 1e-05, %v2505_v53 }
0x1274   :  { %3388 = vrsqrt.f32 %v2508_v54 }
0x1275   :  { %3390 = vrsqrt.f32 %v2507_v55 }
0x127e   :  { %v3389_v56 = vpop.eup %3388 }
0x127f   :  { %v3391_v58 = vpop.eup %3390  ;;  %v2512_v59 = vmul.f32 %v3389_v56, %v2496_v35 }
0x1280   :  { %v2511_v60 = vmul.f32 %v3391_v58, %v2495_v36 }
0x1281   :  { %v2520_v61 = vmul.f32 %v2883_v57, %v2512_v59 }
0x1282   :  { %v2519_v62 = vmul.f32 %v2883_v57, %v2511_v60 }
0x1283   :  { %v2528_v63 = vadd.f32 %v2884_v34, %v2520_v61 }
0x1284   :  { %v2527_v0 = vadd.f32 %v2884_v34, %v2519_v62 }
0x1285   :  { %v2530_v1 = vmul.f32 %v2528_v63, %v4716_v22 }
0x1286   :  { %v2529_v39 = vmul.f32 %v2527_v0, %v4714_v12 }
0x1288   :  { %3161 = vmatprep.mubr.msk.f32.mxu1 %vm432_vm0, %v2529_v39 }
0x1289   :  { %3162 = vmatmul.mubr.msk.f32.vlgmr.msra.gmra.mrb[24].mxu1 %vm432_vm0, %v2530_v1 }
0x135c   :  { %v3163_v10 = vpop.f32.mrb[24].mxu1 }
0x135d   :  { %v2620_v11 = vadd.f32 %v3163_v10, %v2885_v9  ;;  %v2614_v14 = vpop.f32.mrb[25].mxu1 }
0x135e   :  { %v2615_v13 = vadd.f32 %v2885_v9, %v2614_v14 }
0x135f   :  { %v2624_v16 = vmax.f32 %v2620_v11, 0.0 }
0x1360   :  { %v2623_v15 = vmax.f32 %v2615_v13, 0.0 }
0x1362   :  { %3180 = vmatprep.mubr.msk.f32.mxu0 %vm2640_vm9, %v2623_v15 }
0x1363   :  { %3181 = vmatmul.mubr.msk.f32.vlgmr.msra.gmra.mrb[20].mxu0 %vm2640_vm9, %v2624_v16 }
0x1436   :  { %v3182_v18 = vpop.f32.mrb[20].mxu0 }
0x1437   :  { %v2719_v19 = vadd.f32 %v3182_v18, %v2888_v17  ;;  %v2713_v20 = vpop.f32.mrb[21].mxu0 }
0x1438   :  { %v2714_v21 = vadd.f32 %v2888_v17, %v2713_v20 }
0x1439   :  { %v2723_v23 = vadd.f32 %v2719_v19, %v2530_v1 }
0x143a   :  { %v2722_v26 = vadd.f32 %v2714_v21, %v2529_v39 }
0x143b   :  { %v2729_v27 = vsel %vm432_vm0, %v2723_v23, 0.0 }
0x143c   :  { %2730 = vadd.xlane.f32.xlu0 %v2729_v27  ;;  %v2726_v28 = vsel %vm432_vm0, %v2722_v26, 0.0 }
0x143d   :  { %2727 = vadd.xlane.f32.xlu1 %v2726_v28 }
0x14c9   :  { %v2731_v29 = vpop.xlane.xlu0 %2730 }
0x14ca   :  { %v2733_v30 = vmul.f32 0.03125, %v2731_v29  ;;  %v2728_v32 = vpop.xlane.xlu1 %2727 }
0x14cb   :  { %v2732_v33 = vmul.f32 0.03125, %v2728_v32 }
0x14cc   :  { %v2735_v35 = vsub.f32 %v2723_v23, %v2733_v30 }
0x14cd   :  { %v2734_v36 = vsub.f32 %v2722_v26, %v2732_v33 }
0x14ce   :  { %v2737_v37 = vmul.f32 %v2735_v35, %v2735_v35 }
0x14cf   :  { %v2736_v38 = vmul.f32 %v2734_v36, %v2734_v36 }
0x14d0   :  { %v2741_v40 = vsel %vm432_vm0, %v2737_v37, 0.0 }
0x14d1   :  { %2742 = vadd.xlane.f32.xlu0 %v2741_v40  ;;  %v2738_v25 = vsel %vm432_vm0, %v2736_v38, 0.0 }
0x14d2   :  { %2739 = vadd.xlane.f32.xlu1 %v2738_v25 }
0x14d3   :  { %3957 = shalt.err (!%p3954_p8)
}
0x14d4   :  { %s4966_s15 = sld [smem:[#allocation73_spill]] }
0x14da   :  { %s3958_s29 = scalar_lea.hbm %s4966_s15, 512 }
0x14db   :  { %p3959_p9 = scmp.ne.s32.totalorder %s4966_s15, %s3958_s29  ;;  %p3962_p10 = scmp.lt.u32.totalorder %s3958_s29, %s4966_s15 }
0x14dd   :  { %p3964_p11 = pnand %p3962_p10, %p3959_p9 }
0x14df   :  { %3967 = shalt.err (!%p3964_p11)
}
0x14e0   :  { %2795 = dma.vmem_to_hbm [thread:$0]  %s2790_s4, 512, %s4966_s15, [#allocation43], %s4952_s7, %s4952_s7, %s4951_s0  }
0x14e1   :  { %s4081_s10 = smov [#allocation44]  }
0x14e2   :  { %s2801_s26 = sshll.u32 %s4081_s10, 4  ;;  %s2802_s26 = int_to_ptr.vmem [resolvable:$true] %s2801_s26 }
0x14e3   :  { %s3968_s11 = scalar_lea.vmem %s2802_s26, 512  ;;  %p3973_p13 = scmp.lt.s32.totalorder %s2802_s26, %s2802_s26 }
0x14e4   :  { %p3969_p12 = scmp.ne.s32.totalorder %s2802_s26, %s3968_s11  ;;  %p3974_p0 = scmp.lt.s32.totalorder %s3968_s11, %s3968_s11 }
0x14e6   :  { %p3975_p1 = por %p3974_p0, %p3973_p13 }
0x14e8   :  { %p3976_p2 = pnand %p3975_p1, %p3969_p12 }
0x14ea   :  { %3979 = shalt.err (!%p3976_p2)
}
0x14eb   :  { %s4967_s23 = sld [smem:[#allocation74_spill]] }
0x14f1   :  { %s3980_s19 = scalar_lea.hbm %s4967_s23, 512 }
0x14f2   :  { %p3981_p3 = scmp.ne.s32.totalorder %s4967_s23, %s3980_s19  ;;  %p3984_p4 = scmp.lt.u32.totalorder %s3980_s19, %s4967_s23 }
0x14f4   :  { %p3986_p5 = pnand %p3984_p4, %p3981_p3 }
0x14f6   :  { %3989 = shalt.err (!%p3986_p5)
}
0x14f7   :  { %2807 = dma.vmem_to_hbm [thread:$0]  %s2802_s26, 512, %s4967_s23, [#allocation43], %s4952_s7, %s4952_s7, %s4951_s0   ;;  %v2891_v45 = vld [vmem:[#allocation38] ss:$0 sm:$0xff]  ;;  %v2892_v5 = vld [vmem:[#allocation40] ss:$0 sm:$0xff] }
0x14f8   :  { %s4082_s13 = smov [#allocation41]  }
0x14f9   :  { %s2777_s30 = sshll.u32 %s4082_s13, 4  ;;  %s2778_s30 = int_to_ptr.vmem [resolvable:$true] %s2777_s30 }
0x14fa   :  { %s3990_s8 = scalar_lea.vmem %s2778_s30, 256  ;;  %p3995_p7 = scmp.lt.s32.totalorder %s2778_s30, %s2778_s30 }
0x14fb   :  { %p3991_p6 = scmp.ne.s32.totalorder %s2778_s30, %s3990_s8  ;;  %p3996_p8 = scmp.lt.s32.totalorder %s3990_s8, %s3990_s8 }
0x14fd   :  { %p3997_p9 = por %p3996_p8, %p3995_p7 }
0x14ff   :  { %p3998_p10 = pnand %p3997_p9, %p3991_p6 }
0x155e   :  { %v2743_v24 = vpop.xlane.xlu0 %2742 }
0x155f   :  { %v2745_v41 = vmul.f32 0.03125, %v2743_v24  ;;  %v2740_v31 = vpop.xlane.xlu1 %2739 }
0x1560   :  { %v2744_v42 = vmul.f32 0.03125, %v2740_v31 }
0x1561   :  { %v2747_v43 = vadd.f32 1e-05, %v2745_v41 }
0x1562   :  { %v2746_v2 = vadd.f32 1e-05, %v2744_v42 }
0x1563   :  { %3392 = vrsqrt.f32 %v2747_v43 }
0x1564   :  { %3394 = vrsqrt.f32 %v2746_v2 }
0x156d   :  { %v3393_v44 = vpop.eup %3392 }
0x156e   :  { %v3395_v8 = vpop.eup %3394  ;;  %v2751_v46 = vmul.f32 %v3393_v44, %v2735_v35 }
0x156f   :  { %v2750_v47 = vmul.f32 %v3395_v8, %v2734_v36 }
0x1570   :  { %v2759_v48 = vmul.f32 %v2891_v45, %v2751_v46 }
0x1571   :  { %v2758_v49 = vmul.f32 %v2891_v45, %v2750_v47 }
0x1572   :  { %v2767_v50 = vadd.f32 %v2892_v5, %v2759_v48 }
0x1573   :  { %v2766_v51 = vadd.f32 %v2892_v5, %v2758_v49 }
0x1574   :  { %v2769_v52 = vmul.f32 %v2767_v50, %v4716_v22 }
0x1575   :  { %v2768_v7 = vmul.f32 %v2766_v51, %v4714_v12 }
0x1576   :  { %2771 = vst.msk [vmem:[#allocation41 + $0x8] sm:$0xff] %vm432_vm0, %v2769_v52 }
0x1577   :  { %2770 = vst.msk [vmem:[#allocation41] sm:$0xff] %vm432_vm0, %v2768_v7 }
0x1578   :  { %4001 = shalt.err (!%p3998_p10)
}
0x1579   :  { %s4968_s25 = sld [smem:[#allocation72_spill]] }
0x157f   :  { %s4002_s9 = scalar_lea.hbm %s4968_s25, 256 }
0x1580   :  { %p4003_p11 = scmp.ne.s32.totalorder %s4968_s25, %s4002_s9  ;;  %p4006_p12 = scmp.lt.u32.totalorder %s4002_s9, %s4968_s25 }
0x1582   :  { %p4008_p13 = pnand %p4006_p12, %p4003_p11 }
0x1584   :  { %4011 = shalt.err (!%p4008_p13)
}
0x1585   :  { %2783 = dma.vmem_to_hbm [thread:$0]  %s2778_s30, 256, %s4968_s25, [#allocation4], %s4952_s7, %s4952_s7, %s4951_s0  }
0x1586   :  { %4038 = dma.done.wait [#allocation4], 256  }
0x1587   :  { %4039 = vsyncadd [#allocation4], 4294967040 }
0x1588   :  { %4040 = dma.done.wait [#allocation43], 1024  }
0x1589   :  { %4041 = vsyncadd [#allocation43], 4294966272 }
0x158a   :  { %2817 = vsyncpa [#allocation3], 1 }
0x158b   :  { %2818 = vsyncpa [#allocation6], 1 }
0x158c   :  { %2819 = vsyncpa [#allocation9], 1 }
0x158d   :  { %2820 = vsyncpa [#allocation12], 1 }
0x158e   :  { %2821 = vsyncpa [#allocation15], 1 }
0x158f   :  { %2822 = vsyncpa [#allocation18], 1 }
0x1590   :  { %2823 = vsyncpa [#allocation21], 1 }
0x1591   :  { %2824 = vsyncpa [#allocation24], 1 }
0x1592   :  { %2825 = vsyncpa [#allocation27], 1 }
0x1593   :  { %2826 = vsyncpa [#allocation30], 1 }
0x1594   :  { %2827 = vsyncpa [#allocation33], 1 }
0x1595   :  { %2828 = vsyncpa [#allocation36], 1 }
0x1596   :  { %2829 = vsyncpa [#allocation39], 1 }
0x1597   :  { %2830 = vsyncpa [#allocation4], 1 }
0x1598   :  { %2831 = vsyncpa [#allocation43], 1 }

</bundles_post_ra>
